<compile_context>
chip_gen: v6e
topology: v6e:2x2x1
jax: 0.10.0
libtpu: 0.0.40
codegen_flags: <defaults>
</compile_context>

<pallas_src>
import functools
import math

import jax
import jax.numpy as jnp
from jax.experimental import pallas as pl
from jax.experimental.pallas import tpu as pltpu

LANE = 128
SUBLANE = 8


def _round_up(n: int, m: int) -> int:
    return ((n + m - 1) // m) * m


def _pad2d(a, rows: int, cols: int):
    r, c = a.shape
    if (r, c) == (rows, cols):
        return a
    return jnp.pad(a, ((0, rows - r), (0, cols - c)))


def _default_vmem_limit_bytes() -> int:
    """~85% of this generation's physical VMEM (128 MiB v5e/v6e, 64 MiB/TC v7x)."""
    try:
        cap = int(pltpu.get_tpu_info().vmem_capacity_bytes)
    except Exception:
        cap = 64 * 1024 * 1024  # conservative (fits every generation)
    return int(cap * 0.85)


def mlp_kernel(x_ref, w1_ref, b1_ref, w2_ref, b2_ref, w3_ref, b3_ref, o_ref,
               *, precision):
    # x streams in as f32; cast to the weight compute dtype (bf16 fast path) on
    # the VPU right before the MXU — avoids any padded/cast copy of x in HBM.
    x = x_ref[...].astype(w1_ref.dtype)

    # Layer 1: Linear + ReLU (f32 MXU accumulate, f32 VPU epilogue — v5e safe).
    h1 = jnp.dot(x, w1_ref[...],
                 preferred_element_type=jnp.float32, precision=precision)
    h1 = jnp.maximum(h1 + b1_ref[...], 0.0)

    # Layer 2: Linear + ReLU.
    h2 = jnp.dot(h1.astype(w2_ref.dtype), w2_ref[...],
                 preferred_element_type=jnp.float32, precision=precision)
    h2 = jnp.maximum(h2 + b2_ref[...], 0.0)

    # Layer 3: Linear (no activation).
    out = jnp.dot(h2.astype(w3_ref.dtype), w3_ref[...],
                  preferred_element_type=jnp.float32, precision=precision)
    o_ref[...] = (out + b3_ref[...]).astype(o_ref.dtype)


def prepare_params(params, *, compute_dtype=jnp.bfloat16):
    """One-time parameter prep (hoisted out of the per-call forward path).

    params: (w1 [in,hid], b1 [1,hid], w2 [hid,hid], b2 [1,hid], w3 [hid,out], b3 [1,out])
            — weights stored transposed vs torch ([in, out]) so the kernel does x @ W + b.

    Pads hidden/output feature dims to 128 lanes (lane-dense MXU/VPU work and
    unmasked output stores) and casts matmul operands to compute_dtype (bf16 by
    default).  Biases stay f32 for the f32 epilogue.  The input feature dim is
    left un-padded (it is only a contraction dim).  Padding is exact: padded
    hidden cols have w=0, b=0 -> ReLU(0)=0 -> zero rows in the next weight.
    """
    w1, b1, w2, b2, w3, b3 = params
    in_dim, hid = w1.shape
    out_dim = w3.shape[1]
    hid_p = _round_up(hid, LANE)
    out_p = _round_up(out_dim, LANE)
    return dict(
        w1=_pad2d(w1, in_dim, hid_p).astype(compute_dtype),
        b1=_pad2d(b1, 1, hid_p).astype(jnp.float32),
        w2=_pad2d(w2, hid_p, hid_p).astype(compute_dtype),
        b2=_pad2d(b2, 1, hid_p).astype(jnp.float32),
        w3=_pad2d(w3, hid_p, out_p).astype(compute_dtype),
        b3=_pad2d(b3, 1, out_p).astype(jnp.float32),
        in_dim=in_dim, hid_p=hid_p, out_dim=out_dim, out_p=out_p,
        compute_dtype=jnp.dtype(compute_dtype),
    )


def net_forward(x, prepped, *, tile_m: int = 1024, vmem_limit_bytes=None,
                precision=None, single_buffer_weights: bool = True):
    """Fused MLP forward: ReLU(ReLU(x@W1+b1)@W2+b2)@W3+b3.

    x: [B, in_dim] float32 (un-padded, un-copied).
    prepped: output of prepare_params().
    returns: [B, out_dim] float32.
    """
    w1, b1, w2, b2, w3, b3 = (prepped[k] for k in ("w1", "b1", "w2", "b2", "w3", "b3"))
    B, in_dim = x.shape
    assert in_dim == prepped["in_dim"], "x feature dim does not match prepared params"
    hid_p, out_p, out_dim = prepped["hid_p"], prepped["out_p"], prepped["out_dim"]
    cdt = prepped["compute_dtype"]

    # Batch tiling: 1-D grid over batch rows, ragged last tile handled by Pallas
    # masking (no zero-padded batch rows written to HBM).  Balance tile sizes so
    # the trailing tile is never mostly padding.
    if B <= tile_m:
        tm = B                                   # single block (full-dim exemption)
    else:
        g = pl.cdiv(B, tile_m)
        tm = _round_up(pl.cdiv(B, g), SUBLANE)   # near-equal tiles, 8-row aligned
    grid = (pl.cdiv(B, tm),)

    if vmem_limit_bytes is None:
        vmem_limit_bytes = _default_vmem_limit_bytes()

    itemsize = jnp.dtype(cdt).itemsize
    flops = 2 * B * (in_dim * hid_p + hid_p * hid_p + hid_p * out_p)
    bytes_accessed = (
        B * in_dim * x.dtype.itemsize                                 # x (streamed, f32)
        + (in_dim * hid_p + hid_p * hid_p + hid_p * out_p) * itemsize  # weights (resident)
        + (2 * hid_p + out_p) * 4                                      # biases
        + B * out_p * 4                                                # output (streamed)
    )

    kernel = functools.partial(mlp_kernel, precision=precision)

    def _call(use_single_buffer_weights):
        # Weights/biases never change across the grid -> constant index_map keeps
        # them VMEM-resident; Buffered(1) removes the useless second buffer.
        wmode = ({"pipeline_mode": pl.Buffered(1)}
                 if use_single_buffer_weights else {})
        grid_spec = pltpu.PrefetchScalarGridSpec(
            num_scalar_prefetch=0,
            grid=grid,
            in_specs=[
                # x: streamed per batch tile (auto double-buffered by BlockSpec).
                pl.BlockSpec((tm, in_dim), lambda i: (i, 0)),
                pl.BlockSpec((in_dim, hid_p), lambda i: (0, 0), **wmode),
                pl.BlockSpec((1, hid_p), lambda i: (0, 0), **wmode),
                pl.BlockSpec((hid_p, hid_p), lambda i: (0, 0), **wmode),
                pl.BlockSpec((1, hid_p), lambda i: (0, 0), **wmode),
                pl.BlockSpec((hid_p, out_p), lambda i: (0, 0), **wmode),
                pl.BlockSpec((1, out_p), lambda i: (0, 0), **wmode),
            ],
            out_specs=pl.BlockSpec((tm, out_p), lambda i: (i, 0)),
        )
        return pl.pallas_call(
            kernel,
            out_shape=jax.ShapeDtypeStruct((B, out_p), jnp.float32),
            grid_spec=grid_spec,
            compiler_params=pltpu.CompilerParams(
                # On v7x, pltpu.CORE_PARALLEL here shards batch tiles across the
                # two TensorCores (weights replicated per TC); "parallel" is the
                # portable choice across v5e/v6e/v7x.
                dimension_semantics=("parallel",),
                vmem_limit_bytes=vmem_limit_bytes,
            ),
            cost_estimate=pl.CostEstimate(
                flops=flops, transcendentals=0, bytes_accessed=bytes_accessed),
        )(x, w1, b1, w2, b2, w3, b3)

    if single_buffer_weights:
        try:
            out_padded = _call(True)
        except Exception:
            # Fallback if this backend rejects single-buffered pipeline_mode.
            out_padded = _call(False)
    else:
        out_padded = _call(False)

    return out_padded if out_p == out_dim else out_padded[:, :out_dim]


def init_linear(key, fan_in, fan_out):
    """PyTorch-style nn.Linear init (uniform in [-1/sqrt(fan_in), 1/sqrt(fan_in)]),
    stored as [fan_in, fan_out] (transposed vs torch) and bias as [1, fan_out]."""
    kw, kb = jax.random.split(key)
    bound = 1.0 / math.sqrt(fan_in)
    w = jax.random.uniform(kw, (fan_in, fan_out), jnp.float32, -bound, bound)
    b = jax.random.uniform(kb, (1, fan_out), jnp.float32, -bound, bound)
    return w, b


if __name__ == "__main__":
    # Small, deliberately non-aligned shapes: the wrapper pads hid/out to 128
    # lanes (once, in prepare_params), leaves x / in_dim un-padded, and tiles
    # the batch so the grid runs >1 step (second tile ragged) with resident weights.
    batch, in_dim, hidden_dim, out_dim = 200, 16, 32, 8

    key = jax.random.PRNGKey(0)
    kx, k1, k2, k3 = jax.random.split(key, 4)

    x = jax.random.normal(kx, (batch, in_dim), jnp.float32)
    w1, b1 = init_linear(k1, in_dim, hidden_dim)
    w2, b2 = init_linear(k2, hidden_dim, hidden_dim)
    w3, b3 = init_linear(k3, hidden_dim, out_dim)
    params = (w1, b1, w2, b2, w3, b3)

    # Pure-JAX reference.
    h = jnp.maximum(x @ w1 + b1, 0.0)
    h = jnp.maximum(h @ w2 + b2, 0.0)
    ref = h @ w3 + b3

    # Fast (default) path: bf16 MXU operands, f32 accumulate + epilogue.
    # tile_m=128 -> two batch tiles (104 + ragged 96) with VMEM-resident weights.
    prepped_bf16 = prepare_params(params, compute_dtype=jnp.bfloat16)
    out_bf16 = jax.block_until_ready(net_forward(x, prepped_bf16, tile_m=128))
    assert out_bf16.shape == (batch, out_dim)
    assert jnp.allclose(out_bf16, ref, atol=5e-2, rtol=5e-2), "bf16 path mismatch vs reference"

    # Exact path: f32 operands, single batch tile (default tile_m), tight tolerance.
    prepped_f32 = prepare_params(params, compute_dtype=jnp.float32)
    out_f32 = jax.block_until_ready(net_forward(x, prepped_f32))
    assert out_f32.shape == (batch, out_dim)
    assert jnp.allclose(out_f32, ref, atol=1e-4, rtol=1e-4), "f32 path mismatch vs reference"

    print("KERNEL_OK")
</pallas_src>

<mosaic_0001>
module attributes {stable_mosaic.version = 11 : i64} {
  func.func @mlp_kernel(%arg0: i32, %arg1: memref<104x16xf32, #tpu.memory_space<vmem>>, %arg2: memref<16x128xbf16, #tpu.memory_space<vmem>>, %arg3: memref<1x128xf32, #tpu.memory_space<vmem>>, %arg4: memref<128x128xbf16, #tpu.memory_space<vmem>>, %arg5: memref<1x128xf32, #tpu.memory_space<vmem>>, %arg6: memref<128x128xbf16, #tpu.memory_space<vmem>>, %arg7: memref<1x128xf32, #tpu.memory_space<vmem>>, %arg8: memref<104x128xf32, #tpu.memory_space<vmem>>) attributes {dimension_semantics = [#tpu.dimension_semantics<parallel>], iteration_bounds = array<i64: 2>, scalar_prefetch = 0 : i64, scratch_operands = 0 : i64, tpu.core_type = #tpu.core_type<tc>, window_params = [{transform_indices = @transform_0, window_bounds = array<i64: 104, 16>}, {pipeline_mode = #tpu.pipeline_mode<synchronous>, transform_indices = @transform_1, window_bounds = array<i64: 16, 128>}, {pipeline_mode = #tpu.pipeline_mode<synchronous>, transform_indices = @transform_2, window_bounds = array<i64: 1, 128>}, {pipeline_mode = #tpu.pipeline_mode<synchronous>, transform_indices = @transform_3, window_bounds = array<i64: 128, 128>}, {pipeline_mode = #tpu.pipeline_mode<synchronous>, transform_indices = @transform_4, window_bounds = array<i64: 1, 128>}, {pipeline_mode = #tpu.pipeline_mode<synchronous>, transform_indices = @transform_5, window_bounds = array<i64: 128, 128>}, {pipeline_mode = #tpu.pipeline_mode<synchronous>, transform_indices = @transform_6, window_bounds = array<i64: 1, 128>}, {transform_indices = @transform_7, window_bounds = array<i64: 104, 128>}]} {
    %c0 = arith.constant 0 : index
    %c0_0 = arith.constant 0 : index
    %0 = vector.load %arg1[%c0, %c0_0] : memref<104x16xf32, #tpu.memory_space<vmem>>, vector<104x16xf32>
    %1 = arith.truncf %0 : vector<104x16xf32> to vector<104x16xbf16>
    %c0_1 = arith.constant 0 : index
    %c0_2 = arith.constant 0 : index
    %2 = vector.load %arg2[%c0_1, %c0_2] : memref<16x128xbf16, #tpu.memory_space<vmem>>, vector<16x128xbf16>
    %cst = arith.constant dense<0.000000e+00> : vector<104x128xf32>
    %3 = tpu.matmul %1, %2, %cst {dimension_numbers = #tpu.dot_dimension_numbers<[1], [0], [0], [1], [0, 0, 1, 1], [], []>} : vector<104x16xbf16>, vector<16x128xbf16>, vector<104x128xf32> -> vector<104x128xf32>
    %c0_3 = arith.constant 0 : index
    %c0_4 = arith.constant 0 : index
    %4 = vector.load %arg3[%c0_3, %c0_4] : memref<1x128xf32, #tpu.memory_space<vmem>>, vector<1x128xf32>
    %5 = vector.broadcast %4 : vector<1x128xf32> to vector<104x128xf32>
    %6 = arith.addf %3, %5 : vector<104x128xf32>
    %cst_5 = arith.constant 0.000000e+00 : f32
    %7 = vector.broadcast %cst_5 : f32 to vector<104x128xf32>
    %8 = arith.maximumf %6, %7 : vector<104x128xf32>
    %9 = arith.truncf %8 : vector<104x128xf32> to vector<104x128xbf16>
    %c0_6 = arith.constant 0 : index
    %c0_7 = arith.constant 0 : index
    %10 = vector.load %arg4[%c0_6, %c0_7] : memref<128x128xbf16, #tpu.memory_space<vmem>>, vector<128x128xbf16>
    %cst_8 = arith.constant dense<0.000000e+00> : vector<104x128xf32>
    %11 = tpu.matmul %9, %10, %cst_8 {dimension_numbers = #tpu.dot_dimension_numbers<[1], [0], [0], [1], [0, 0, 1, 1], [], []>} : vector<104x128xbf16>, vector<128x128xbf16>, vector<104x128xf32> -> vector<104x128xf32>
    %c0_9 = arith.constant 0 : index
    %c0_10 = arith.constant 0 : index
    %12 = vector.load %arg5[%c0_9, %c0_10] : memref<1x128xf32, #tpu.memory_space<vmem>>, vector<1x128xf32>
    %13 = vector.broadcast %12 : vector<1x128xf32> to vector<104x128xf32>
    %14 = arith.addf %11, %13 : vector<104x128xf32>
    %cst_11 = arith.constant 0.000000e+00 : f32
    %15 = vector.broadcast %cst_11 : f32 to vector<104x128xf32>
    %16 = arith.maximumf %14, %15 : vector<104x128xf32>
    %17 = arith.truncf %16 : vector<104x128xf32> to vector<104x128xbf16>
    %c0_12 = arith.constant 0 : index
    %c0_13 = arith.constant 0 : index
    %18 = vector.load %arg6[%c0_12, %c0_13] : memref<128x128xbf16, #tpu.memory_space<vmem>>, vector<128x128xbf16>
    %cst_14 = arith.constant dense<0.000000e+00> : vector<104x128xf32>
    %19 = tpu.matmul %17, %18, %cst_14 {dimension_numbers = #tpu.dot_dimension_numbers<[1], [0], [0], [1], [0, 0, 1, 1], [], []>} : vector<104x128xbf16>, vector<128x128xbf16>, vector<104x128xf32> -> vector<104x128xf32>
    %c0_15 = arith.constant 0 : index
    %c0_16 = arith.constant 0 : index
    %20 = vector.load %arg7[%c0_15, %c0_16] : memref<1x128xf32, #tpu.memory_space<vmem>>, vector<1x128xf32>
    %21 = vector.broadcast %20 : vector<1x128xf32> to vector<104x128xf32>
    %22 = arith.addf %19, %21 : vector<104x128xf32>
    %c0_17 = arith.constant 0 : index
    %c0_18 = arith.constant 0 : index
    %23 = vector.load %arg8[%c0_17, %c0_18] : memref<104x128xf32, #tpu.memory_space<vmem>>, vector<104x128xf32>
    tpu.vector_store %arg8[%c0_17, %c0_18], %22 {strides = array<i32>} : memref<104x128xf32, #tpu.memory_space<vmem>>, vector<104x128xf32>,
    return
  }
  func.func @transform_0(%arg0: i32) -> (i32, i32) {
    %c0_i32 = arith.constant 0 : i32
    %c0_i32_0 = arith.constant 0 : i32
    return %arg0, %c0_i32 : i32, i32
  }
  func.func @transform_1(%arg0: i32) -> (i32, i32) {
    %c0_i32 = arith.constant 0 : i32
    %c0_i32_0 = arith.constant 0 : i32
    %c0_i32_1 = arith.constant 0 : i32
    return %c0_i32, %c0_i32_0 : i32, i32
  }
  func.func @transform_2(%arg0: i32) -> (i32, i32) {
    %c0_i32 = arith.constant 0 : i32
    %c0_i32_0 = arith.constant 0 : i32
    %c0_i32_1 = arith.constant 0 : i32
    return %c0_i32, %c0_i32_0 : i32, i32
  }
  func.func @transform_3(%arg0: i32) -> (i32, i32) {
    %c0_i32 = arith.constant 0 : i32
    %c0_i32_0 = arith.constant 0 : i32
    %c0_i32_1 = arith.constant 0 : i32
    return %c0_i32, %c0_i32_0 : i32, i32
  }
  func.func @transform_4(%arg0: i32) -> (i32, i32) {
    %c0_i32 = arith.constant 0 : i32
    %c0_i32_0 = arith.constant 0 : i32
    %c0_i32_1 = arith.constant 0 : i32
    return %c0_i32, %c0_i32_0 : i32, i32
  }
  func.func @transform_5(%arg0: i32) -> (i32, i32) {
    %c0_i32 = arith.constant 0 : i32
    %c0_i32_0 = arith.constant 0 : i32
    %c0_i32_1 = arith.constant 0 : i32
    return %c0_i32, %c0_i32_0 : i32, i32
  }
  func.func @transform_6(%arg0: i32) -> (i32, i32) {
    %c0_i32 = arith.constant 0 : i32
    %c0_i32_0 = arith.constant 0 : i32
    %c0_i32_1 = arith.constant 0 : i32
    return %c0_i32, %c0_i32_0 : i32, i32
  }
  func.func @transform_7(%arg0: i32) -> (i32, i32) {
    %c0_i32 = arith.constant 0 : i32
    %c0_i32_0 = arith.constant 0 : i32
    return %arg0, %c0_i32 : i32, i32
  }
}

module attributes {stable_mosaic.version = 11 : i64} {
  func.func @mlp_kernel(%arg0: i32, %arg1: memref<104x16xf32, #tpu.memory_space<vmem>>, %arg2: memref<16x128xbf16, #tpu.memory_space<vmem>>, %arg3: memref<1x128xf32, #tpu.memory_space<vmem>>, %arg4: memref<128x128xbf16, #tpu.memory_space<vmem>>, %arg5: memref<1x128xf32, #tpu.memory_space<vmem>>, %arg6: memref<128x128xbf16, #tpu.memory_space<vmem>>, %arg7: memref<1x128xf32, #tpu.memory_space<vmem>>, %arg8: memref<104x128xf32, #tpu.memory_space<vmem>>) attributes {dimension_semantics = [#tpu.dimension_semantics<parallel>], iteration_bounds = array<i64: 2>, scalar_prefetch = 0 : i64, scratch_operands = 0 : i64, tpu.core_type = #tpu.core_type<tc>, window_params = [{transform_indices = @transform_0, window_bounds = array<i64: 104, 16>}, {pipeline_mode = #tpu.pipeline_mode<synchronous>, transform_indices = @transform_1, window_bounds = array<i64: 16, 128>}, {pipeline_mode = #tpu.pipeline_mode<synchronous>, transform_indices = @transform_2, window_bounds = array<i64: 1, 128>}, {pipeline_mode = #tpu.pipeline_mode<synchronous>, transform_indices = @transform_3, window_bounds = array<i64: 128, 128>}, {pipeline_mode = #tpu.pipeline_mode<synchronous>, transform_indices = @transform_4, window_bounds = array<i64: 1, 128>}, {pipeline_mode = #tpu.pipeline_mode<synchronous>, transform_indices = @transform_5, window_bounds = array<i64: 128, 128>}, {pipeline_mode = #tpu.pipeline_mode<synchronous>, transform_indices = @transform_6, window_bounds = array<i64: 1, 128>}, {transform_indices = @transform_7, window_bounds = array<i64: 104, 128>}]} {
    %c0 = arith.constant 0 : index
    %c0_0 = arith.constant 0 : index
    %0 = vector.load %arg1[%c0, %c0_0] : memref<104x16xf32, #tpu.memory_space<vmem>>, vector<104x16xf32>
    %1 = arith.truncf %0 : vector<104x16xf32> to vector<104x16xbf16>
    %c0_1 = arith.constant 0 : index
    %c0_2 = arith.constant 0 : index
    %2 = vector.load %arg2[%c0_1, %c0_2] : memref<16x128xbf16, #tpu.memory_space<vmem>>, vector<16x128xbf16>
    %cst = arith.constant dense<0.000000e+00> : vector<104x128xf32>
    %3 = tpu.matmul %1, %2, %cst {dimension_numbers = #tpu.dot_dimension_numbers<[1], [0], [0], [1], [0, 0, 1, 1], [], []>} : vector<104x16xbf16>, vector<16x128xbf16>, vector<104x128xf32> -> vector<104x128xf32>
    %c0_3 = arith.constant 0 : index
    %c0_4 = arith.constant 0 : index
    %4 = vector.load %arg3[%c0_3, %c0_4] : memref<1x128xf32, #tpu.memory_space<vmem>>, vector<1x128xf32>
    %5 = vector.broadcast %4 : vector<1x128xf32> to vector<104x128xf32>
    %6 = arith.addf %3, %5 : vector<104x128xf32>
    %cst_5 = arith.constant 0.000000e+00 : f32
    %7 = vector.broadcast %cst_5 : f32 to vector<104x128xf32>
    %8 = arith.maximumf %6, %7 : vector<104x128xf32>
    %9 = arith.truncf %8 : vector<104x128xf32> to vector<104x128xbf16>
    %c0_6 = arith.constant 0 : index
    %c0_7 = arith.constant 0 : index
    %10 = vector.load %arg4[%c0_6, %c0_7] : memref<128x128xbf16, #tpu.memory_space<vmem>>, vector<128x128xbf16>
    %cst_8 = arith.constant dense<0.000000e+00> : vector<104x128xf32>
    %11 = tpu.matmul %9, %10, %cst_8 {dimension_numbers = #tpu.dot_dimension_numbers<[1], [0], [0], [1], [0, 0, 1, 1], [], []>} : vector<104x128xbf16>, vector<128x128xbf16>, vector<104x128xf32> -> vector<104x128xf32>
    %c0_9 = arith.constant 0 : index
    %c0_10 = arith.constant 0 : index
    %12 = vector.load %arg5[%c0_9, %c0_10] : memref<1x128xf32, #tpu.memory_space<vmem>>, vector<1x128xf32>
    %13 = vector.broadcast %12 : vector<1x128xf32> to vector<104x128xf32>
    %14 = arith.addf %11, %13 : vector<104x128xf32>
    %cst_11 = arith.constant 0.000000e+00 : f32
    %15 = vector.broadcast %cst_11 : f32 to vector<104x128xf32>
    %16 = arith.maximumf %14, %15 : vector<104x128xf32>
    %17 = arith.truncf %16 : vector<104x128xf32> to vector<104x128xbf16>
    %c0_12 = arith.constant 0 : index
    %c0_13 = arith.constant 0 : index
    %18 = vector.load %arg6[%c0_12, %c0_13] : memref<128x128xbf16, #tpu.memory_space<vmem>>, vector<128x128xbf16>
    %cst_14 = arith.constant dense<0.000000e+00> : vector<104x128xf32>
    %19 = tpu.matmul %17, %18, %cst_14 {dimension_numbers = #tpu.dot_dimension_numbers<[1], [0], [0], [1], [0, 0, 1, 1], [], []>} : vector<104x128xbf16>, vector<128x128xbf16>, vector<104x128xf32> -> vector<104x128xf32>
    %c0_15 = arith.constant 0 : index
    %c0_16 = arith.constant 0 : index
    %20 = vector.load %arg7[%c0_15, %c0_16] : memref<1x128xf32, #tpu.memory_space<vmem>>, vector<1x128xf32>
    %21 = vector.broadcast %20 : vector<1x128xf32> to vector<104x128xf32>
    %22 = arith.addf %19, %21 : vector<104x128xf32>
    %c0_17 = arith.constant 0 : index
    %c0_18 = arith.constant 0 : index
    %23 = vector.load %arg8[%c0_17, %c0_18] : memref<104x128xf32, #tpu.memory_space<vmem>>, vector<104x128xf32>
    tpu.vector_store %arg8[%c0_17, %c0_18], %22 {strides = array<i32>} : memref<104x128xf32, #tpu.memory_space<vmem>>, vector<104x128xf32>,
    return
  }
  func.func @transform_0(%arg0: i32) -> (i32, i32) {
    %c0_i32 = arith.constant 0 : i32
    %c0_i32_0 = arith.constant 0 : i32
    return %arg0, %c0_i32 : i32, i32
  }
  func.func @transform_1(%arg0: i32) -> (i32, i32) {
    %c0_i32 = arith.constant 0 : i32
    %c0_i32_0 = arith.constant 0 : i32
    %c0_i32_1 = arith.constant 0 : i32
    return %c0_i32, %c0_i32_0 : i32, i32
  }
  func.func @transform_2(%arg0: i32) -> (i32, i32) {
    %c0_i32 = arith.constant 0 : i32
    %c0_i32_0 = arith.constant 0 : i32
    %c0_i32_1 = arith.constant 0 : i32
    return %c0_i32, %c0_i32_0 : i32, i32
  }
  func.func @transform_3(%arg0: i32) -> (i32, i32) {
    %c0_i32 = arith.constant 0 : i32
    %c0_i32_0 = arith.constant 0 : i32
    %c0_i32_1 = arith.constant 0 : i32
    return %c0_i32, %c0_i32_0 : i32, i32
  }
  func.func @transform_4(%arg0: i32) -> (i32, i32) {
    %c0_i32 = arith.constant 0 : i32
    %c0_i32_0 = arith.constant 0 : i32
    %c0_i32_1 = arith.constant 0 : i32
    return %c0_i32, %c0_i32_0 : i32, i32
  }
  func.func @transform_5(%arg0: i32) -> (i32, i32) {
    %c0_i32 = arith.constant 0 : i32
    %c0_i32_0 = arith.constant 0 : i32
    %c0_i32_1 = arith.constant 0 : i32
    return %c0_i32, %c0_i32_0 : i32, i32
  }
  func.func @transform_6(%arg0: i32) -> (i32, i32) {
    %c0_i32 = arith.constant 0 : i32
    %c0_i32_0 = arith.constant 0 : i32
    %c0_i32_1 = arith.constant 0 : i32
    return %c0_i32, %c0_i32_0 : i32, i32
  }
  func.func @transform_7(%arg0: i32) -> (i32, i32) {
    %c0_i32 = arith.constant 0 : i32
    %c0_i32_0 = arith.constant 0 : i32
    return %arg0, %c0_i32 : i32, i32
  }
}

</mosaic_0001>

<bundles_post_ra>
// kernel: tpu_custom_call.1
= control target key start
LH: loop header
LB: loop body
LE: loop exit
PB: predicated region body
PF: predicated region fallthrough
CT: control target
= control target key end

     0   :  { %12 = vsyncpa [#allocation3], 0  ;;  %s1576_s0 = inlined_call_operand.vmem [shape: f32[200,16], index: 0, kind: input, shape index: {}]   ;;  %s1577_s1 = inlined_call_operand.vmem [shape: bf16[16,128], index: 1, kind: input, shape index: {}]   ;;  %s1578_s2 = inlined_call_operand.vmem [shape: f32[1,128], index: 2, kind: input, shape index: {}]   ;;  %s1579_s3 = inlined_call_operand.vmem [shape: bf16[128,128], index: 3, kind: input, shape index: {}]   ;;  %s1580_s4 = inlined_call_operand.vmem [shape: f32[1,128], index: 4, kind: input, shape index: {}]   ;;  %s1581_s5 = inlined_call_operand.vmem [shape: bf16[128,128], index: 5, kind: input, shape index: {}]   ;;  %s1582_s6 = inlined_call_operand.vmem [shape: f32[1,128], index: 6, kind: input, shape index: {}]   ;;  %s1583_s7 = inlined_call_operand.hbm [shape: f32[200,128], index: 7, kind: output, shape index: {}]  }
   0x1   :  { %14 = vsyncpa [#allocation3 + $0x1], 0  ;;  %s1268_s24 = smov 0   ;;  %s1270_s25 = smov 0  }
   0x2   :  { %s1272_s26 = smov 0   ;;  %s1274_s27 = smov 0  }
   0x3 LB: > { %s1289_s28 = sadd.s32 4294967295, %s1221_s27   ;;  %s903_s29 = sadd.s32 4294967294, %s1221_s27   ;;  %s1221_s27 = sphi %s1274_s27, %s1589_s27   ;;  %s1217_s26 = sphi %s1272_s26, %s1588_s26   ;;  %s1213_s25 = sphi %s1270_s25, %s1587_s25   ;;  %s1209_s24 = sphi %s1268_s24, %s1586_s24  }
   0x4   : > { %s1293_s30 = sadd.s32 1, %s1221_s27   ;;  %s179_s8 = sadd.s32 1, %s1217_s26 }
   0x5   : > { %s176_s9 = ssub.s32 %s1221_s27, %s1293_s30  ;;  %p189_p0 = scmp.ne.s32.totalorder %s1217_s26, %s1213_s25 }
   0x6   : > { %p177_p1 = scmp.eq.s32.totalorder %s176_s9, 0  ;;  %p190_p2 = scmp.eq.s32.totalorder %s1289_s28, 1 }
   0x7   : > { %p195_p3 = scmp.ne.s32.totalorder %s1213_s25, %s1209_s24  ;;  %p196_p4 = scmp.eq.s32.totalorder %s903_s29, 1 }
   0x8   : > { %s1304_s10 = scalar_select %p177_p1, %s1217_s26, %s179_s8  }
   0x9   : > { %p1306_p5 = por %p190_p2, %p189_p0  ;;  %p1310_p6 = por %p196_p4, %p195_p3 }
   0xa   : > { %p906_p7 = scmp.ge.s32.totalorder %s1221_s27, 1  ;;  %p249_p8 = scmp.lt.s32.totalorder %s1221_s27, 3 }
   0xc   : > { %p250_p9 = pnand %p906_p7, %p249_p8 }
   0xd   : > { %s1321_s15 = smul.u32 (!%p250_p9), 13, %s1289_s28  ;;  %s282_s18 = sand.u32 (!%p250_p9), 1, %s1213_s25  }
   0xe   : > { %253 = sbr.rel (%p250_p9) target bundleno = 706 (0x2c2), region = 48  ;;  %s1516_s23 = scalar_lea.sflag (!%p250_p9), [#allocation3], %s282_s18 }
   0xf   : > { %p290_p10 = scmp.lt.s32.totalorder (!%p250_p9), %s1321_s15, 24  ;;  %s1101_s19 = smul.u32 (!%p250_p9), 104, %s282_s18 }
  0x11   : > { %s1499_s22 = scalar_lea.vmem (!%p250_p9), [#allocation2], %s1101_s19 }
  0x13   : > { %v1144_v0 = vld [vmem:[%s1577_s1] sm:$0xff]   ;;  %v1223_v1 = vmov 0.0   ;;  %vm1224_vm0 = vmmov 0   ;;  %s291_s16 = scalar_select %p290_p10, %s1321_s15, 24  ;;  %vm340_vm1 = vcmask 130048   ;;  %v1145_v8 = vld [vmem:[%s1579_s3 + $0x38] sm:$0xff]  }
  0x14   : > { %981 = vmatprep.subr.bf16.mxu0 %v1223_v1  ;;  %1099 = vmatprep.subr.bf16.mxu1 %v1223_v1  ;;  %v1146_v13 = vld [vmem:[%s1579_s3 + $0x30] sm:$0xff]   ;;  %v1147_v16 = vld [vmem:[%s1579_s3 + $0x28] sm:$0xff]   ;;  %v1148_v21 = vld [vmem:[%s1579_s3 + $0x20] sm:$0xff]   ;;  %s830_s29 = ssub.s32 (%p1306_p5), 25, %s1321_s15 }
  0x15   : > { %982 = vmatpush3.bf16.msra.mxu0 %v1144_v0  ;;  %983 = vmatprep.mubr.msk.bf16.mxu0 %vm1224_vm0, %v1223_v1  ;;  %s907_s17 = sshll.u32 %s291_s16, 3  ;;  %v1149_v23 = vld [vmem:[%s1579_s3 + $0x18] sm:$0xff]   ;;  %v1150_v27 = vld [vmem:[%s1579_s3 + $0x10] sm:$0xff]   ;;  %v1151_v28 = vld [vmem:[%s1579_s3 + $0x8] sm:$0xff]   ;;  %p831_p11 = scmp.lt.s32.totalorder (%p1306_p5), %s830_s29, 13 }
  0x16   : > { %1100 = vmatpush3.bf16.msra.mxu1 %v1144_v0  ;;  %999 = vmatprep.mubr.msk.bf16.mxu1 %vm1224_vm0, %v1223_v1  ;;  %s1335_s20 = scalar_lea.vmem %s1576_s0, %s907_s17  ;;  %v1152_v29 = vld [vmem:[%s1579_s3] sm:$0xff]   ;;  %v1153_v30 = vld [vmem:[%s1581_s5 + $0x38] sm:$0xff]   ;;  %v1154_v31 = vld [vmem:[%s1581_s5 + $0x30] sm:$0xff]  }
  0x17   : > { %1011 = vmatprep.subr.bf16.mxu1 %v1223_v1  ;;  %1055 = vmatprep.subr.bf16.mxu0 %v1223_v1  ;;  %v305_v2 = vld [vmem:[%s1335_s20] sm:$0xff]  ;;  %v306_v3 = vld [vmem:[%s1335_s20 + $0x8] sm:$0xff]  ;;  %v307_v6 = vld [vmem:[%s1335_s20 + $0x10] sm:$0xff] }
  0x18   : > { %v318_v4 = vpack.c.bf16 %v306_v3, %v305_v2  ;;  %v313_v5 = vld [vmem:[%s1335_s20 + $0x40] sm:$0xff]  ;;  %v314_v7 = vld [vmem:[%s1335_s20 + $0x48] sm:$0xff]  ;;  %v308_v9 = vld [vmem:[%s1335_s20 + $0x18] sm:$0xff] }
  0x19   : > { %v322_v10 = vpack.c.bf16 %v314_v7, %v313_v5  ;;  %v315_v11 = vld [vmem:[%s1335_s20 + $0x50] sm:$0xff]  ;;  %v316_v12 = vld [vmem:[%s1335_s20 + $0x58] sm:$0xff]  ;;  %v319_v14 = vpack.c.bf16 %v308_v9, %v307_v6  ;;  %v309_v17 = vld [vmem:[%s1335_s20 + $0x20] sm:$0xff] }
  0x1a   : > { %984 = vmatmul.mubr.msk.bf16.vlgmr.msra.gmra.mxu0 %vm340_vm1, %v318_v4  ;;  %v323_v15 = vpack.c.bf16 %v316_v12, %v315_v11  ;;  %v310_v18 = vld [vmem:[%s1335_s20 + $0x28] sm:$0xff]  ;;  %v317_v20 = vld [vmem:[%s1335_s20 + $0x60] sm:$0xff]  ;;  %v311_v24 = vld [vmem:[%s1335_s20 + $0x30] sm:$0xff] }
  0x1b   : > { %987 = vmatprep.mubr.msk.bf16.mxu0 %vm1224_vm0, %v1223_v1  ;;  %1000 = vmatmul.mubr.msk.bf16.vlgmr.msra.gmra.mxu1 %vm340_vm1, %v322_v10  ;;  %v320_v19 = vpack.c.bf16 %v310_v18, %v309_v17  ;;  %v324_v22 = vpack.c.bf16 %v317_v20, %v317_v20  ;;  %v312_v25 = vld [vmem:[%s1335_s20 + $0x38] sm:$0xff]  ;;  %v1155_v32 = vld [vmem:[%s1581_s5 + $0x28] sm:$0xff]   ;;  %v1156_v33 = vld [vmem:[%s1581_s5 + $0x20] sm:$0xff]  }
  0x1c   : > { %1003 = vmatprep.mubr.msk.bf16.mxu1 %vm1224_vm0, %v1223_v1  ;;  %1012 = vmatpush3.bf16.msra.mxu1 %v1145_v8  ;;  %v321_v26 = vpack.c.bf16 %v312_v25, %v311_v24  ;;  %v1157_v34 = vld [vmem:[%s1581_s5 + $0x18] sm:$0xff]   ;;  %v1158_v35 = vld [vmem:[%s1581_s5 + $0x10] sm:$0xff]   ;;  %v1429_v36 = vld [vmem:[%s1578_s2] ss:$0 sm:$0xff] }
  0x1d   : > { %1013 = vmatprep.subr.bf16.mxu1 %v1223_v1  ;;  %1056 = vmatpush3.bf16.msra.mxu0 %v1153_v30 }
  0x1e   : > { %1057 = vmatprep.subr.bf16.mxu0 %v1223_v1 }
  0x20   : > { %1014 = vmatpush3.bf16.msra.mxu1 %v1146_v13 }
  0x21   : > { %1015 = vmatprep.subr.bf16.mxu1 %v1223_v1  ;;  %1058 = vmatpush3.bf16.msra.mxu0 %v1154_v31 }
  0x22   : > { %988 = vmatmul.mubr.msk.bf16.gmra.mxu0 %vm340_vm1, %v319_v14  ;;  %1059 = vmatprep.subr.bf16.mxu0 %v1223_v1 }
  0x23   : > { %991 = vmatprep.mubr.msk.bf16.mxu0 %vm1224_vm0, %v1223_v1  ;;  %1004 = vmatmul.mubr.msk.bf16.gmra.mxu1 %vm340_vm1, %v323_v15 }
  0x24   : > { %1007 = vmatprep.mubr.msk.bf16.mxu1 %vm1224_vm0, %v1223_v1  ;;  %1016 = vmatpush3.bf16.msra.mxu1 %v1147_v16 }
  0x25   : > { %1017 = vmatprep.subr.bf16.mxu1 %v1223_v1  ;;  %1060 = vmatpush3.bf16.msra.mxu0 %v1155_v32 }
  0x26   : > { %1061 = vmatprep.subr.bf16.mxu0 %v1223_v1 }
  0x28   : > { %1018 = vmatpush3.bf16.msra.mxu1 %v1148_v21 }
  0x29   : > { %1019 = vmatprep.subr.bf16.mxu1 %v1223_v1  ;;  %1062 = vmatpush3.bf16.msra.mxu0 %v1156_v33 }
  0x2a   : > { %992 = vmatmul.mubr.msk.bf16.gmra.mxu0 %vm340_vm1, %v320_v19  ;;  %1063 = vmatprep.subr.bf16.mxu0 %v1223_v1 }
  0x2b   : > { %995 = vmatprep.mubr.msk.bf16.mxu0 %vm1224_vm0, %v1223_v1  ;;  %1008 = vmatmul.mubr.msk.bf16.gmra.mxu1 %vm340_vm1, %v324_v22 }
  0x2c   : > { %1020 = vmatpush3.bf16.msra.mxu1 %v1149_v23  ;;  %1027 = vmatprep.mubr.msk.bf16.mxu1 %vm1224_vm0, %v1223_v1 }
  0x2d   : > { %1021 = vmatprep.subr.bf16.mxu1 %v1223_v1  ;;  %1064 = vmatpush3.bf16.msra.mxu0 %v1157_v34 }
  0x2e   : > { %1065 = vmatprep.subr.bf16.mxu0 %v1223_v1 }
  0x30   : > { %1022 = vmatpush3.bf16.msra.mxu1 %v1150_v27 }
  0x31   : > { %1023 = vmatprep.subr.bf16.mxu1 %v1223_v1  ;;  %1066 = vmatpush3.bf16.msra.mxu0 %v1158_v35  ;;  %v1159_v35 = vld [vmem:[%s1581_s5 + $0x8] sm:$0xff]  }
  0x32   : > { %996 = vmatmul.mubr.msk.bf16.gmra.mxu0 %vm340_vm1, %v321_v26  ;;  %1067 = vmatprep.subr.bf16.mxu0 %v1223_v1 }
  0x33   : > { %1071 = vmatprep.mubr.msk.bf16.mxu0 %vm1224_vm0, %v1223_v1 }
  0x34   : > { %1024 = vmatpush3.bf16.msra.mxu1 %v1151_v28 }
  0x35   : > { %1025 = vmatprep.subr.bf16.mxu1 %v1223_v1  ;;  %1068 = vmatpush3.bf16.msra.mxu0 %v1159_v35 }
  0x36   : > { %1069 = vmatprep.subr.bf16.mxu0 %v1223_v1 }
  0x38   : > { %1026 = vmatpush3.bf16.msra.mxu1 %v1152_v29 }
  0xda   : > { %v396_v37 = vpop.f32.mrf.mxu0 }
  0xdb   : > { %v397_v39 = vadd.f32 %v1429_v36, %v396_v37  ;;  %v428_v40 = vpop.f32.mrf.mxu1  ;;  %v1160_v37 = vld [vmem:[%s1581_s5] sm:$0xff]  }
  0xdc   : > { %v985_v38 = vpop.f32.mrf.mxu0  ;;  %v429_v21 = vadd.f32 %v1429_v36, %v428_v40  ;;  %1070 = vmatpush3.bf16.msra.mxu0 %v1160_v37  ;;  %v926_v37 = vld [vmem:[%s1582_s6] ss:$0 sm:$0xff] }
  0xdd   : > { %v1001_v43 = vpop.f32.mrf.mxu1  ;;  %v450_v45 = vmax.f32 %v397_v39, 0.0 }
  0xde   : > { %v399_v41 = vpop.f32.mrf.mxu0  ;;  %v458_v24 = vmax.f32 %v429_v21, 0.0 }
  0xdf   : > { %v400_v42 = vadd.f32 %v1429_v36, %v399_v41  ;;  %v431_v47 = vpop.f32.mrf.mxu1 }
  0xe0   : > { %v986_v44 = vpop.f32.mrf.mxu0  ;;  %v432_v23 = vadd.f32 %v1429_v36, %v431_v47 }
  0xe1   : > { %v451_v46 = vmax.f32 %v400_v42, 0.0  ;;  %v1002_v50 = vpop.f32.mrf.mxu1 }
  0xe2   : > { %v404_v48 = vpop.f32.mrf.mxu0  ;;  %v459_v25 = vmax.f32 %v432_v23, 0.0 }
  0xe3   : > { %v463_v49 = vpack.c.bf16 %v451_v46, %v450_v45  ;;  %v405_v52 = vadd.f32 %v1429_v36, %v404_v48  ;;  %v436_v53 = vpop.f32.mrf.mxu1 }
  0xe4   : > { %v989_v51 = vpop.f32.mrf.mxu0  ;;  %v467_v26 = vpack.c.bf16 %v459_v25, %v458_v24  ;;  %v437_v27 = vadd.f32 %v1429_v36, %v436_v53 }
  0xe5   : > { %1028 = vmatmul.mubr.bf16.vlgmr.msra.gmra.mxu1 %v463_v49  ;;  %v1005_v56 = vpop.f32.mrf.mxu1  ;;  %v452_v58 = vmax.f32 %v405_v52, 0.0 }
  0xe6   : > { %v407_v54 = vpop.f32.mrf.mxu0  ;;  %1031 = vmatprep.mubr.msk.bf16.mxu1 %vm1224_vm0, %v1223_v1  ;;  %v460_v29 = vmax.f32 %v437_v27, 0.0 }
  0xe7   : > { %v408_v55 = vadd.f32 %v1429_v36, %v407_v54  ;;  %v439_v60 = vpop.f32.mrf.mxu1 }
  0xe8   : > { %v990_v57 = vpop.f32.mrf.mxu0  ;;  %v440_v28 = vadd.f32 %v1429_v36, %v439_v60 }
  0xe9   : > { %v453_v59 = vmax.f32 %v408_v55, 0.0  ;;  %v1006_v63 = vpop.f32.mrf.mxu1 }
  0xea   : > { %v412_v61 = vpop.f32.mrf.mxu0  ;;  %v461_v30 = vmax.f32 %v440_v28, 0.0 }
  0xeb   : > { %v464_v62 = vpack.c.bf16 %v453_v59, %v452_v58  ;;  %v413_v2 = vadd.f32 %v1429_v36, %v412_v61  ;;  %v444_v3 = vpop.f32.mrf.mxu1 }
  0xec   : > { %v993_v0 = vpop.f32.mrf.mxu0  ;;  %v445_v31 = vadd.f32 %v1429_v36, %v444_v3  ;;  %v468_v32 = vpack.c.bf16 %v461_v30, %v460_v29 }
  0xed   : > { %1032 = vmatmul.mubr.bf16.gmra.mxu1 %v464_v62  ;;  %v1009_v6 = vpop.f32.mrf.mxu1  ;;  %v454_v8 = vmax.f32 %v413_v2, 0.0 }
  0xee   : > { %v415_v4 = vpop.f32.mrf.mxu0  ;;  %1035 = vmatprep.mubr.msk.bf16.mxu1 %vm1224_vm0, %v1223_v1  ;;  %v462_v33 = vmax.f32 %v445_v31, 0.0 }
  0xef   : > { %v416_v5 = vadd.f32 %v1429_v36, %v415_v4  ;;  %v447_v10 = vpop.f32.mrf.mxu1 }
  0xf0   : > { %v994_v7 = vpop.f32.mrf.mxu0  ;;  %v469_v34 = vpack.c.bf16 %v462_v33, %v462_v33 }
  0xf1   : > { %v455_v9 = vmax.f32 %v416_v5, 0.0  ;;  %v1010_v13 = vpop.f32.mrf.mxu1 }
  0xf2   : > { %v420_v11 = vpop.f32.mrf.mxu0 }
  0xf3   : > { %v465_v12 = vpack.c.bf16 %v455_v9, %v454_v8  ;;  %v421_v15 = vadd.f32 %v1429_v36, %v420_v11 }
  0xf4   : > { %v997_v14 = vpop.f32.mrf.mxu0 }
  0xf5   : > { %1036 = vmatmul.mubr.bf16.gmra.mxu1 %v465_v12  ;;  %v456_v19 = vmax.f32 %v421_v15, 0.0 }
  0xf6   : > { %v423_v16 = vpop.f32.mrf.mxu0  ;;  %1039 = vmatprep.mubr.msk.bf16.mxu1 %vm1224_vm0, %v1223_v1 }
  0xf7   : > { %v424_v17 = vadd.f32 %v1429_v36, %v423_v16  ;;  %v1466_v36 = vld [vmem:[%s1580_s4] ss:$0 sm:$0xff] }
  0xf8   : > { %v998_v18 = vpop.f32.mrf.mxu0 }
  0xf9   : > { %v457_v20 = vmax.f32 %v424_v17, 0.0 }
  0xfb   : > { %v466_v22 = vpack.c.bf16 %v457_v20, %v456_v19 }
  0xfd   : > { %1040 = vmatmul.mubr.bf16.gmra.mxu1 %v466_v22 }
  0xfe   : > { %1043 = vmatprep.mubr.msk.bf16.mxu1 %vm1224_vm0, %v1223_v1 }
 0x105   : > { %1044 = vmatmul.mubr.bf16.gmra.mxu1 %v467_v26 }
 0x106   : > { %1047 = vmatprep.mubr.msk.bf16.mxu1 %vm1224_vm0, %v1223_v1 }
 0x10d   : > { %1048 = vmatmul.mubr.bf16.gmra.mxu1 %v468_v32 }
 0x10e   : > { %1051 = vmatprep.mubr.msk.bf16.mxu1 %vm1224_vm0, %v1223_v1 }
 0x115   : > { %1052 = vmatmul.mubr.bf16.gmra.mxu1 %v469_v34 }
 0x1a5   : > { %v575_v38 = vpop.f32.mrf.mxu1 }
 0x1a6   : > { %v576_v40 = vadd.f32 %v1466_v36, %v575_v38 }
 0x1a7   : > { %v1029_v39 = vpop.f32.mrf.mxu1 }
 0x1a8   : > { %v629_v44 = vmax.f32 %v576_v40, 0.0 }
 0x1a9   : > { %v578_v41 = vpop.f32.mrf.mxu1 }
 0x1aa   : > { %v579_v42 = vadd.f32 %v1466_v36, %v578_v41 }
 0x1ab   : > { %v1030_v43 = vpop.f32.mrf.mxu1 }
 0x1ac   : > { %v630_v45 = vmax.f32 %v579_v42, 0.0 }
 0x1ad   : > { %v583_v46 = vpop.f32.mrf.mxu1 }
 0x1ae   : > { %v642_v47 = vpack.c.bf16 %v630_v45, %v629_v44  ;;  %v584_v49 = vadd.f32 %v1466_v36, %v583_v46 }
 0x1af   : > { %v1033_v48 = vpop.f32.mrf.mxu1 }
 0x1b0   : > { %1072 = vmatmul.mubr.bf16.vlgmr.msra.gmra.mxu0 %v642_v47  ;;  %v631_v53 = vmax.f32 %v584_v49, 0.0 }
 0x1b1   : > { %v586_v50 = vpop.f32.mrf.mxu1  ;;  %1075 = vmatprep.mubr.msk.bf16.mxu0 %vm1224_vm0, %v1223_v1 }
 0x1b2   : > { %v587_v51 = vadd.f32 %v1466_v36, %v586_v50 }
 0x1b3   : > { %v1034_v52 = vpop.f32.mrf.mxu1 }
 0x1b4   : > { %v632_v54 = vmax.f32 %v587_v51, 0.0 }
 0x1b5   : > { %v591_v55 = vpop.f32.mrf.mxu1 }
 0x1b6   : > { %v643_v56 = vpack.c.bf16 %v632_v54, %v631_v53  ;;  %v592_v58 = vadd.f32 %v1466_v36, %v591_v55 }
 0x1b7   : > { %v1037_v57 = vpop.f32.mrf.mxu1 }
 0x1b8   : > { %1076 = vmatmul.mubr.bf16.gmra.mxu0 %v643_v56  ;;  %v633_v62 = vmax.f32 %v592_v58, 0.0 }
 0x1b9   : > { %v594_v59 = vpop.f32.mrf.mxu1  ;;  %1079 = vmatprep.mubr.msk.bf16.mxu0 %vm1224_vm0, %v1223_v1 }
 0x1ba   : > { %v595_v60 = vadd.f32 %v1466_v36, %v594_v59 }
 0x1bb   : > { %v1038_v61 = vpop.f32.mrf.mxu1 }
 0x1bc   : > { %v634_v63 = vmax.f32 %v595_v60, 0.0 }
 0x1bd   : > { %v599_v0 = vpop.f32.mrf.mxu1 }
 0x1be   : > { %v644_v2 = vpack.c.bf16 %v634_v63, %v633_v62  ;;  %v600_v4 = vadd.f32 %v1466_v36, %v599_v0 }
 0x1bf   : > { %v1041_v3 = vpop.f32.mrf.mxu1 }
 0x1c0   : > { %1080 = vmatmul.mubr.bf16.gmra.mxu0 %v644_v2  ;;  %v635_v8 = vmax.f32 %v600_v4, 0.0 }
 0x1c1   : > { %v602_v5 = vpop.f32.mrf.mxu1  ;;  %1083 = vmatprep.mubr.msk.bf16.mxu0 %vm1224_vm0, %v1223_v1 }
 0x1c2   : > { %v603_v6 = vadd.f32 %v1466_v36, %v602_v5 }
 0x1c3   : > { %v1042_v7 = vpop.f32.mrf.mxu1 }
 0x1c4   : > { %v636_v9 = vmax.f32 %v603_v6, 0.0 }
 0x1c5   : > { %v607_v10 = vpop.f32.mrf.mxu1 }
 0x1c6   : > { %v645_v11 = vpack.c.bf16 %v636_v9, %v635_v8  ;;  %v608_v13 = vadd.f32 %v1466_v36, %v607_v10 }
 0x1c7   : > { %v1045_v12 = vpop.f32.mrf.mxu1 }
 0x1c8   : > { %1084 = vmatmul.mubr.bf16.gmra.mxu0 %v645_v11  ;;  %v637_v17 = vmax.f32 %v608_v13, 0.0 }
 0x1c9   : > { %v610_v14 = vpop.f32.mrf.mxu1  ;;  %1087 = vmatprep.mubr.msk.bf16.mxu0 %vm1224_vm0, %v1223_v1 }
 0x1ca   : > { %v611_v15 = vadd.f32 %v1466_v36, %v610_v14 }
 0x1cb   : > { %v1046_v16 = vpop.f32.mrf.mxu1 }
 0x1cc   : > { %v638_v18 = vmax.f32 %v611_v15, 0.0 }
 0x1cd   : > { %v615_v19 = vpop.f32.mrf.mxu1 }
 0x1ce   : > { %v646_v20 = vpack.c.bf16 %v638_v18, %v637_v17  ;;  %v616_v22 = vadd.f32 %v1466_v36, %v615_v19 }
 0x1cf   : > { %v1049_v21 = vpop.f32.mrf.mxu1 }
 0x1d0   : > { %1088 = vmatmul.mubr.bf16.gmra.mxu0 %v646_v20  ;;  %v639_v26 = vmax.f32 %v616_v22, 0.0 }
 0x1d1   : > { %v618_v23 = vpop.f32.mrf.mxu1  ;;  %1091 = vmatprep.mubr.msk.bf16.mxu0 %vm1224_vm0, %v1223_v1 }
 0x1d2   : > { %v619_v24 = vadd.f32 %v1466_v36, %v618_v23 }
 0x1d3   : > { %v1050_v25 = vpop.f32.mrf.mxu1 }
 0x1d4   : > { %v640_v27 = vmax.f32 %v619_v24, 0.0 }
 0x1d5   : > { %v623_v28 = vpop.f32.mrf.mxu1 }
 0x1d6   : > { %v647_v29 = vpack.c.bf16 %v640_v27, %v639_v26  ;;  %v624_v30 = vadd.f32 %v1466_v36, %v623_v28 }
 0x1d7   : > { %v1053_v31 = vpop.f32.mrf.mxu1 }
 0x1d8   : > { %v641_v32 = vmax.f32 %v624_v30, 0.0  ;;  %1092 = vmatmul.mubr.bf16.gmra.mxu0 %v647_v29 }
 0x1d9   : > { %v626_v33 = vpop.f32.mrf.mxu1  ;;  %1095 = vmatprep.mubr.msk.bf16.mxu0 %vm1224_vm0, %v1223_v1 }
 0x1da   : > { %v648_v35 = vpack.c.bf16 %v641_v32, %v641_v32 }
 0x1db   : > { %v1054_v34 = vpop.f32.mrf.mxu1 }
 0x1e0   : > { %1096 = vmatmul.mubr.bf16.gmra.mxu0 %v648_v35 }
 0x270   : > { %v754_v38 = vpop.f32.mrf.mxu0 }
 0x271   : > { %v755_v39 = vadd.f32 %v926_v37, %v754_v38 }
 0x272   : > { %v1073_v36 = vpop.f32.mrf.mxu0 }
 0x273   : > { %808 = vst [vmem:[%s1499_s22] sm:$0xff] %v755_v39 }
 0x274   : > { %v757_v1 = vpop.f32.mrf.mxu0 }
 0x275   : > { %v758_v40 = vadd.f32 %v926_v37, %v757_v1 }
 0x276   : > { %v1074_v41 = vpop.f32.mrf.mxu0 }
 0x277   : > { %809 = vst [vmem:[%s1499_s22 + $0x8] sm:$0xff] %v758_v40 }
 0x278   : > { %v762_v42 = vpop.f32.mrf.mxu0 }
 0x279   : > { %v763_v43 = vadd.f32 %v926_v37, %v762_v42 }
 0x27a   : > { %v1077_v44 = vpop.f32.mrf.mxu0 }
 0x27b   : > { %810 = vst [vmem:[%s1499_s22 + $0x10] sm:$0xff] %v763_v43 }
 0x27c   : > { %v765_v45 = vpop.f32.mrf.mxu0 }
 0x27d   : > { %v766_v46 = vadd.f32 %v926_v37, %v765_v45 }
 0x27e   : > { %v1078_v47 = vpop.f32.mrf.mxu0 }
 0x27f   : > { %811 = vst [vmem:[%s1499_s22 + $0x18] sm:$0xff] %v766_v46 }
 0x280   : > { %v770_v48 = vpop.f32.mrf.mxu0 }
 0x281   : > { %v771_v49 = vadd.f32 %v926_v37, %v770_v48 }
 0x282   : > { %v1081_v50 = vpop.f32.mrf.mxu0 }
 0x283   : > { %812 = vst [vmem:[%s1499_s22 + $0x20] sm:$0xff] %v771_v49 }
 0x284   : > { %v773_v51 = vpop.f32.mrf.mxu0 }
 0x285   : > { %v774_v52 = vadd.f32 %v926_v37, %v773_v51 }
 0x286   : > { %v1082_v53 = vpop.f32.mrf.mxu0 }
 0x287   : > { %813 = vst [vmem:[%s1499_s22 + $0x28] sm:$0xff] %v774_v52 }
 0x288   : > { %v778_v54 = vpop.f32.mrf.mxu0 }
 0x289   : > { %v779_v55 = vadd.f32 %v926_v37, %v778_v54 }
 0x28a   : > { %v1085_v56 = vpop.f32.mrf.mxu0 }
 0x28b   : > { %814 = vst [vmem:[%s1499_s22 + $0x30] sm:$0xff] %v779_v55 }
 0x28c   : > { %v781_v57 = vpop.f32.mrf.mxu0 }
 0x28d   : > { %v782_v58 = vadd.f32 %v926_v37, %v781_v57 }
 0x28e   : > { %v1086_v59 = vpop.f32.mrf.mxu0 }
 0x28f   : > { %815 = vst [vmem:[%s1499_s22 + $0x38] sm:$0xff] %v782_v58 }
 0x290   : > { %v786_v60 = vpop.f32.mrf.mxu0 }
 0x291   : > { %v787_v61 = vadd.f32 %v926_v37, %v786_v60 }
 0x292   : > { %v1089_v62 = vpop.f32.mrf.mxu0 }
 0x293   : > { %816 = vst [vmem:[%s1499_s22 + $0x40] sm:$0xff] %v787_v61 }
 0x294   : > { %v789_v63 = vpop.f32.mrf.mxu0 }
 0x295   : > { %v790_v0 = vadd.f32 %v926_v37, %v789_v63 }
 0x296   : > { %v1090_v2 = vpop.f32.mrf.mxu0 }
 0x297   : > { %817 = vst [vmem:[%s1499_s22 + $0x48] sm:$0xff] %v790_v0 }
 0x298   : > { %v794_v3 = vpop.f32.mrf.mxu0 }
 0x299   : > { %v795_v4 = vadd.f32 %v926_v37, %v794_v3 }
 0x29a   : > { %v1093_v5 = vpop.f32.mrf.mxu0 }
 0x29b   : > { %818 = vst [vmem:[%s1499_s22 + $0x50] sm:$0xff] %v795_v4 }
 0x29c   : > { %v797_v6 = vpop.f32.mrf.mxu0 }
 0x29d   : > { %v798_v7 = vadd.f32 %v926_v37, %v797_v6 }
 0x29e   : > { %v1094_v8 = vpop.f32.mrf.mxu0 }
 0x29f   : > { %819 = vst [vmem:[%s1499_s22 + $0x58] sm:$0xff] %v798_v7 }
 0x2a0   : > { %v802_v9 = vpop.f32.mrf.mxu0 }
 0x2a1   : > { %v803_v10 = vadd.f32 %v926_v37, %v802_v9 }
 0x2a2   : > { %v1097_v11 = vpop.f32.mrf.mxu0  ;;  %828 = sbr.rel (!%p1306_p5) target bundleno = 706 (0x2c2), region = 52 }
 0x2a3   : > { %820 = vst [vmem:[%s1499_s22 + $0x60] sm:$0xff] %v803_v10 }
 0x2a4   : > { %v805_v12 = vpop.f32.mrf.mxu0 }
 0x2a6   : > { %v1098_v13 = vpop.f32.mrf.mxu0 }
 0x2a7   : > { %s1591_s29 = smov (!%p831_p11, %s830_s29), 13 }
 0x2a8   : > { %s1521_s8 = sshll.u32 %s1591_s29, 7 }
 0x2a9   : > { %s835_s9 = ssub.s32 1664, %s1521_s8 }
 0x2aa   : > { %836 = vsyncadd %s1516_s23, %s835_s9  ;;  %p936_p12 = scmp.ne.s32.totalorder %s1521_s8, 0  ;;  %s942_s13 = smul.u32 1664, %s1289_s28 }
 0x2ab   : > { %s841_s14 = sshll.u32 %s1499_s22, 4  ;;  %s1225_s18 = smov [#allocation2]   ;;  %s1533_s14 = int_to_ptr.vmem [resolvable:$true] %s841_s14 }
 0x2ac   : > { %s1531_s17 = scalar_lea.hbm %s1583_s7, %s942_s13  ;;  %s1161_s15 = scalar_lea.vmem %s1533_s14, %s1521_s8 }
 0x2ad   : > { %p1162_p13 = scmp.ne.s32.totalorder %s1533_s14, %s1161_s15  ;;  %s1165_s19 = sshll.u32 %s1225_s18, 4  ;;  %s1166_s19 = int_to_ptr.vmem [resolvable:$false] %s1165_s19 }
 0x2ae   : > { %s1167_s28 = scalar_lea.vmem %s1166_s19, 3328  ;;  %p1168_p2 = scmp.lt.s32.totalorder %s1533_s14, %s1166_s19 }
 0x2af   : > { %p1163_p0 = pnand %p1162_p13, %p936_p12  ;;  %p1169_p3 = scmp.lt.s32.totalorder %s1167_s28, %s1161_s15 }
 0x2b1   : > { %p1164_p1 = pneg %p1163_p0  ;;  %p1170_p4 = por %p1169_p3, %p1168_p2 }
 0x2b3   : > { %p1171_p5 = pnand %p1170_p4, %p1164_p1 }
 0x2b5   : > { %1174 = shalt.err (!%p1171_p5)
}
 0x2b6   : > { %s1175_s20 = scalar_lea.hbm %s1531_s17, %s1521_s8  ;;  %s1179_s29 = scalar_lea.hbm %s1583_s7, 3200 }
 0x2b7   : > { %p1176_p7 = scmp.ne.s32.totalorder %s1531_s17, %s1175_s20  ;;  %p1180_p10 = scmp.lt.s32.totalorder %s1531_s17, %s1583_s7 }
 0x2b8   : > { %p1181_p11 = scmp.lt.s32.totalorder %s1179_s29, %s1175_s20 }
 0x2b9   : > { %p1177_p8 = pnand %p1176_p7, %p936_p12 }
 0x2ba   : > { %p1182_p13 = por %p1181_p11, %p1180_p10 }
 0x2bb   : > { %p1178_p9 = pneg %p1177_p8 }
 0x2bd   : > { %p1183_p0 = pnand %p1182_p13, %p1178_p9 }
 0x2bf   : > { %1186 = shalt.err (!%p1183_p0)
}
 0x2c0   : > { %s1226_s11 = smov 128   ;;  %s1227_s16 = smov 8  }
 0x2c1   : > { %847 = dma.vmem_to_hbm [thread:$0]  (%p936_p12), %s1533_s14, %s1521_s8, %s1531_s17, %s1516_s23, %s1226_s11, %s1226_s11, %s1227_s16  }
 0x2c2 PF: > { %p1107_p1 = scmp.ge.s32.totalorder %s1221_s27, 2  ;;  %s856_s15 = sand.u32 1, %s1209_s24  }
 0x2c3   : > { %s857_s18 = scalar_lea.sflag [#allocation3], %s856_s15 }
 0x2c4   : > { %p1104_p2 = pnand %p1107_p1, %p1310_p6 }
 0x2c6   : > { %p1105_p3 = pneg %p1104_p2 }
 0x2c8   : > { %1204 = dma.done.wait (%p1105_p3), %s857_s18, 1664  }
 0x2c9   : > { %1206 = vsyncadd (%p1105_p3), %s857_s18, 4294965632  ;;  %p17_p4 = scmp.ge.s32.totalorder %s1293_s30, 4   ;;  %s1586_s24 = smov %s1213_s25 }
 0x2ca   : > { %s1587_s25 = smov %s1217_s26  ;;  %s1588_s26 = smov %s1304_s10 }
 0x2cb   : > { %s1589_s27 = smov %s1293_s30  ;;  %19 = sbr.rel (!%p17_p4) target bundleno = 3 (0x3), region = 83 }
 0x2d0   :  { %862 = vsyncpa [#allocation3], 1 }
 0x2d1   :  { %864 = vsyncpa [#allocation3 + $0x1], 1 }

// kernel: tpu_custom_call.1
= control target key start
LH: loop header
LB: loop body
LE: loop exit
PB: predicated region body
PF: predicated region fallthrough
CT: control target
= control target key end

     0   :  { %12 = vsyncpa [#allocation3], 0  ;;  %s1576_s0 = inlined_call_operand.vmem [shape: f32[200,16], index: 0, kind: input, shape index: {}]   ;;  %s1577_s1 = inlined_call_operand.vmem [shape: bf16[16,128], index: 1, kind: input, shape index: {}]   ;;  %s1578_s2 = inlined_call_operand.vmem [shape: f32[1,128], index: 2, kind: input, shape index: {}]   ;;  %s1579_s3 = inlined_call_operand.vmem [shape: bf16[128,128], index: 3, kind: input, shape index: {}]   ;;  %s1580_s4 = inlined_call_operand.vmem [shape: f32[1,128], index: 4, kind: input, shape index: {}]   ;;  %s1581_s5 = inlined_call_operand.vmem [shape: bf16[128,128], index: 5, kind: input, shape index: {}]   ;;  %s1582_s6 = inlined_call_operand.vmem [shape: f32[1,128], index: 6, kind: input, shape index: {}]   ;;  %s1583_s7 = inlined_call_operand.hbm [shape: f32[200,128], index: 7, kind: output, shape index: {}]  }
   0x1   :  { %14 = vsyncpa [#allocation3 + $0x1], 0  ;;  %s1268_s24 = smov 0   ;;  %s1270_s25 = smov 0  }
   0x2   :  { %s1272_s26 = smov 0   ;;  %s1274_s27 = smov 0  }
   0x3 LB: > { %s1289_s28 = sadd.s32 4294967295, %s1221_s27   ;;  %s903_s29 = sadd.s32 4294967294, %s1221_s27   ;;  %s1221_s27 = sphi %s1274_s27, %s1589_s27   ;;  %s1217_s26 = sphi %s1272_s26, %s1588_s26   ;;  %s1213_s25 = sphi %s1270_s25, %s1587_s25   ;;  %s1209_s24 = sphi %s1268_s24, %s1586_s24  }
   0x4   : > { %s1293_s30 = sadd.s32 1, %s1221_s27   ;;  %s179_s8 = sadd.s32 1, %s1217_s26 }
   0x5   : > { %s176_s9 = ssub.s32 %s1221_s27, %s1293_s30  ;;  %p189_p0 = scmp.ne.s32.totalorder %s1217_s26, %s1213_s25 }
   0x6   : > { %p177_p1 = scmp.eq.s32.totalorder %s176_s9, 0  ;;  %p190_p2 = scmp.eq.s32.totalorder %s1289_s28, 1 }
   0x7   : > { %p195_p3 = scmp.ne.s32.totalorder %s1213_s25, %s1209_s24  ;;  %p196_p4 = scmp.eq.s32.totalorder %s903_s29, 1 }
   0x8   : > { %s1304_s10 = scalar_select %p177_p1, %s1217_s26, %s179_s8  }
   0x9   : > { %p1306_p5 = por %p190_p2, %p189_p0  ;;  %p1310_p6 = por %p196_p4, %p195_p3 }
   0xa   : > { %p906_p7 = scmp.ge.s32.totalorder %s1221_s27, 1  ;;  %p249_p8 = scmp.lt.s32.totalorder %s1221_s27, 3 }
   0xc   : > { %p250_p9 = pnand %p906_p7, %p249_p8 }
   0xd   : > { %s1321_s15 = smul.u32 (!%p250_p9), 13, %s1289_s28  ;;  %s282_s18 = sand.u32 (!%p250_p9), 1, %s1213_s25  }
   0xe   : > { %253 = sbr.rel (%p250_p9) target bundleno = 706 (0x2c2), region = 48  ;;  %s1516_s23 = scalar_lea.sflag (!%p250_p9), [#allocation3], %s282_s18 }
   0xf   : > { %p290_p10 = scmp.lt.s32.totalorder (!%p250_p9), %s1321_s15, 24  ;;  %s1101_s19 = smul.u32 (!%p250_p9), 104, %s282_s18 }
  0x11   : > { %s1499_s22 = scalar_lea.vmem (!%p250_p9), [#allocation2], %s1101_s19 }
  0x13   : > { %v1144_v0 = vld [vmem:[%s1577_s1] sm:$0xff]   ;;  %v1223_v1 = vmov 0.0   ;;  %vm1224_vm0 = vmmov 0   ;;  %s291_s16 = scalar_select %p290_p10, %s1321_s15, 24  ;;  %vm340_vm1 = vcmask 130048   ;;  %v1145_v8 = vld [vmem:[%s1579_s3 + $0x38] sm:$0xff]  }
  0x14   : > { %981 = vmatprep.subr.bf16.mxu0 %v1223_v1  ;;  %1099 = vmatprep.subr.bf16.mxu1 %v1223_v1  ;;  %v1146_v13 = vld [vmem:[%s1579_s3 + $0x30] sm:$0xff]   ;;  %v1147_v16 = vld [vmem:[%s1579_s3 + $0x28] sm:$0xff]   ;;  %v1148_v21 = vld [vmem:[%s1579_s3 + $0x20] sm:$0xff]   ;;  %s830_s29 = ssub.s32 (%p1306_p5), 25, %s1321_s15 }
  0x15   : > { %982 = vmatpush3.bf16.msra.mxu0 %v1144_v0  ;;  %983 = vmatprep.mubr.msk.bf16.mxu0 %vm1224_vm0, %v1223_v1  ;;  %s907_s17 = sshll.u32 %s291_s16, 3  ;;  %v1149_v23 = vld [vmem:[%s1579_s3 + $0x18] sm:$0xff]   ;;  %v1150_v27 = vld [vmem:[%s1579_s3 + $0x10] sm:$0xff]   ;;  %v1151_v28 = vld [vmem:[%s1579_s3 + $0x8] sm:$0xff]   ;;  %p831_p11 = scmp.lt.s32.totalorder (%p1306_p5), %s830_s29, 13 }
  0x16   : > { %1100 = vmatpush3.bf16.msra.mxu1 %v1144_v0  ;;  %999 = vmatprep.mubr.msk.bf16.mxu1 %vm1224_vm0, %v1223_v1  ;;  %s1335_s20 = scalar_lea.vmem %s1576_s0, %s907_s17  ;;  %v1152_v29 = vld [vmem:[%s1579_s3] sm:$0xff]   ;;  %v1153_v30 = vld [vmem:[%s1581_s5 + $0x38] sm:$0xff]   ;;  %v1154_v31 = vld [vmem:[%s1581_s5 + $0x30] sm:$0xff]  }
  0x17   : > { %1011 = vmatprep.subr.bf16.mxu1 %v1223_v1  ;;  %1055 = vmatprep.subr.bf16.mxu0 %v1223_v1  ;;  %v305_v2 = vld [vmem:[%s1335_s20] sm:$0xff]  ;;  %v306_v3 = vld [vmem:[%s1335_s20 + $0x8] sm:$0xff]  ;;  %v307_v6 = vld [vmem:[%s1335_s20 + $0x10] sm:$0xff] }
  0x18   : > { %v318_v4 = vpack.c.bf16 %v306_v3, %v305_v2  ;;  %v313_v5 = vld [vmem:[%s1335_s20 + $0x40] sm:$0xff]  ;;  %v314_v7 = vld [vmem:[%s1335_s20 + $0x48] sm:$0xff]  ;;  %v308_v9 = vld [vmem:[%s1335_s20 + $0x18] sm:$0xff] }
  0x19   : > { %v322_v10 = vpack.c.bf16 %v314_v7, %v313_v5  ;;  %v315_v11 = vld [vmem:[%s1335_s20 + $0x50] sm:$0xff]  ;;  %v316_v12 = vld [vmem:[%s1335_s20 + $0x58] sm:$0xff]  ;;  %v319_v14 = vpack.c.bf16 %v308_v9, %v307_v6  ;;  %v309_v17 = vld [vmem:[%s1335_s20 + $0x20] sm:$0xff] }
  0x1a   : > { %984 = vmatmul.mubr.msk.bf16.vlgmr.msra.gmra.mxu0 %vm340_vm1, %v318_v4  ;;  %v323_v15 = vpack.c.bf16 %v316_v12, %v315_v11  ;;  %v310_v18 = vld [vmem:[%s1335_s20 + $0x28] sm:$0xff]  ;;  %v317_v20 = vld [vmem:[%s1335_s20 + $0x60] sm:$0xff]  ;;  %v311_v24 = vld [vmem:[%s1335_s20 + $0x30] sm:$0xff] }
  0x1b   : > { %987 = vmatprep.mubr.msk.bf16.mxu0 %vm1224_vm0, %v1223_v1  ;;  %1000 = vmatmul.mubr.msk.bf16.vlgmr.msra.gmra.mxu1 %vm340_vm1, %v322_v10  ;;  %v320_v19 = vpack.c.bf16 %v310_v18, %v309_v17  ;;  %v324_v22 = vpack.c.bf16 %v317_v20, %v317_v20  ;;  %v312_v25 = vld [vmem:[%s1335_s20 + $0x38] sm:$0xff]  ;;  %v1155_v32 = vld [vmem:[%s1581_s5 + $0x28] sm:$0xff]   ;;  %v1156_v33 = vld [vmem:[%s1581_s5 + $0x20] sm:$0xff]  }
  0x1c   : > { %1003 = vmatprep.mubr.msk.bf16.mxu1 %vm1224_vm0, %v1223_v1  ;;  %1012 = vmatpush3.bf16.msra.mxu1 %v1145_v8  ;;  %v321_v26 = vpack.c.bf16 %v312_v25, %v311_v24  ;;  %v1157_v34 = vld [vmem:[%s1581_s5 + $0x18] sm:$0xff]   ;;  %v1158_v35 = vld [vmem:[%s1581_s5 + $0x10] sm:$0xff]   ;;  %v1429_v36 = vld [vmem:[%s1578_s2] ss:$0 sm:$0xff] }
  0x1d   : > { %1013 = vmatprep.subr.bf16.mxu1 %v1223_v1  ;;  %1056 = vmatpush3.bf16.msra.mxu0 %v1153_v30 }
  0x1e   : > { %1057 = vmatprep.subr.bf16.mxu0 %v1223_v1 }
  0x20   : > { %1014 = vmatpush3.bf16.msra.mxu1 %v1146_v13 }
  0x21   : > { %1015 = vmatprep.subr.bf16.mxu1 %v1223_v1  ;;  %1058 = vmatpush3.bf16.msra.mxu0 %v1154_v31 }
  0x22   : > { %988 = vmatmul.mubr.msk.bf16.gmra.mxu0 %vm340_vm1, %v319_v14  ;;  %1059 = vmatprep.subr.bf16.mxu0 %v1223_v1 }
  0x23   : > { %991 = vmatprep.mubr.msk.bf16.mxu0 %vm1224_vm0, %v1223_v1  ;;  %1004 = vmatmul.mubr.msk.bf16.gmra.mxu1 %vm340_vm1, %v323_v15 }
  0x24   : > { %1007 = vmatprep.mubr.msk.bf16.mxu1 %vm1224_vm0, %v1223_v1  ;;  %1016 = vmatpush3.bf16.msra.mxu1 %v1147_v16 }
  0x25   : > { %1017 = vmatprep.subr.bf16.mxu1 %v1223_v1  ;;  %1060 = vmatpush3.bf16.msra.mxu0 %v1155_v32 }
  0x26   : > { %1061 = vmatprep.subr.bf16.mxu0 %v1223_v1 }
  0x28   : > { %1018 = vmatpush3.bf16.msra.mxu1 %v1148_v21 }
  0x29   : > { %1019 = vmatprep.subr.bf16.mxu1 %v1223_v1  ;;  %1062 = vmatpush3.bf16.msra.mxu0 %v1156_v33 }
  0x2a   : > { %992 = vmatmul.mubr.msk.bf16.gmra.mxu0 %vm340_vm1, %v320_v19  ;;  %1063 = vmatprep.subr.bf16.mxu0 %v1223_v1 }
  0x2b   : > { %995 = vmatprep.mubr.msk.bf16.mxu0 %vm1224_vm0, %v1223_v1  ;;  %1008 = vmatmul.mubr.msk.bf16.gmra.mxu1 %vm340_vm1, %v324_v22 }
  0x2c   : > { %1020 = vmatpush3.bf16.msra.mxu1 %v1149_v23  ;;  %1027 = vmatprep.mubr.msk.bf16.mxu1 %vm1224_vm0, %v1223_v1 }
  0x2d   : > { %1021 = vmatprep.subr.bf16.mxu1 %v1223_v1  ;;  %1064 = vmatpush3.bf16.msra.mxu0 %v1157_v34 }
  0x2e   : > { %1065 = vmatprep.subr.bf16.mxu0 %v1223_v1 }
  0x30   : > { %1022 = vmatpush3.bf16.msra.mxu1 %v1150_v27 }
  0x31   : > { %1023 = vmatprep.subr.bf16.mxu1 %v1223_v1  ;;  %1066 = vmatpush3.bf16.msra.mxu0 %v1158_v35  ;;  %v1159_v35 = vld [vmem:[%s1581_s5 + $0x8] sm:$0xff]  }
  0x32   : > { %996 = vmatmul.mubr.msk.bf16.gmra.mxu0 %vm340_vm1, %v321_v26  ;;  %1067 = vmatprep.subr.bf16.mxu0 %v1223_v1 }
  0x33   : > { %1071 = vmatprep.mubr.msk.bf16.mxu0 %vm1224_vm0, %v1223_v1 }
  0x34   : > { %1024 = vmatpush3.bf16.msra.mxu1 %v1151_v28 }
  0x35   : > { %1025 = vmatprep.subr.bf16.mxu1 %v1223_v1  ;;  %1068 = vmatpush3.bf16.msra.mxu0 %v1159_v35 }
  0x36   : > { %1069 = vmatprep.subr.bf16.mxu0 %v1223_v1 }
  0x38   : > { %1026 = vmatpush3.bf16.msra.mxu1 %v1152_v29 }
  0xda   : > { %v396_v37 = vpop.f32.mrf.mxu0 }
  0xdb   : > { %v397_v39 = vadd.f32 %v1429_v36, %v396_v37  ;;  %v428_v40 = vpop.f32.mrf.mxu1  ;;  %v1160_v37 = vld [vmem:[%s1581_s5] sm:$0xff]  }
  0xdc   : > { %v985_v38 = vpop.f32.mrf.mxu0  ;;  %v429_v21 = vadd.f32 %v1429_v36, %v428_v40  ;;  %1070 = vmatpush3.bf16.msra.mxu0 %v1160_v37  ;;  %v926_v37 = vld [vmem:[%s1582_s6] ss:$0 sm:$0xff] }
  0xdd   : > { %v1001_v43 = vpop.f32.mrf.mxu1  ;;  %v450_v45 = vmax.f32 %v397_v39, 0.0 }
  0xde   : > { %v399_v41 = vpop.f32.mrf.mxu0  ;;  %v458_v24 = vmax.f32 %v429_v21, 0.0 }
  0xdf   : > { %v400_v42 = vadd.f32 %v1429_v36, %v399_v41  ;;  %v431_v47 = vpop.f32.mrf.mxu1 }
  0xe0   : > { %v986_v44 = vpop.f32.mrf.mxu0  ;;  %v432_v23 = vadd.f32 %v1429_v36, %v431_v47 }
  0xe1   : > { %v451_v46 = vmax.f32 %v400_v42, 0.0  ;;  %v1002_v50 = vpop.f32.mrf.mxu1 }
  0xe2   : > { %v404_v48 = vpop.f32.mrf.mxu0  ;;  %v459_v25 = vmax.f32 %v432_v23, 0.0 }
  0xe3   : > { %v463_v49 = vpack.c.bf16 %v451_v46, %v450_v45  ;;  %v405_v52 = vadd.f32 %v1429_v36, %v404_v48  ;;  %v436_v53 = vpop.f32.mrf.mxu1 }
  0xe4   : > { %v989_v51 = vpop.f32.mrf.mxu0  ;;  %v467_v26 = vpack.c.bf16 %v459_v25, %v458_v24  ;;  %v437_v27 = vadd.f32 %v1429_v36, %v436_v53 }
  0xe5   : > { %1028 = vmatmul.mubr.bf16.vlgmr.msra.gmra.mxu1 %v463_v49  ;;  %v1005_v56 = vpop.f32.mrf.mxu1  ;;  %v452_v58 = vmax.f32 %v405_v52, 0.0 }
  0xe6   : > { %v407_v54 = vpop.f32.mrf.mxu0  ;;  %1031 = vmatprep.mubr.msk.bf16.mxu1 %vm1224_vm0, %v1223_v1  ;;  %v460_v29 = vmax.f32 %v437_v27, 0.0 }
  0xe7   : > { %v408_v55 = vadd.f32 %v1429_v36, %v407_v54  ;;  %v439_v60 = vpop.f32.mrf.mxu1 }
  0xe8   : > { %v990_v57 = vpop.f32.mrf.mxu0  ;;  %v440_v28 = vadd.f32 %v1429_v36, %v439_v60 }
  0xe9   : > { %v453_v59 = vmax.f32 %v408_v55, 0.0  ;;  %v1006_v63 = vpop.f32.mrf.mxu1 }
  0xea   : > { %v412_v61 = vpop.f32.mrf.mxu0  ;;  %v461_v30 = vmax.f32 %v440_v28, 0.0 }
  0xeb   : > { %v464_v62 = vpack.c.bf16 %v453_v59, %v452_v58  ;;  %v413_v2 = vadd.f32 %v1429_v36, %v412_v61  ;;  %v444_v3 = vpop.f32.mrf.mxu1 }
  0xec   : > { %v993_v0 = vpop.f32.mrf.mxu0  ;;  %v445_v31 = vadd.f32 %v1429_v36, %v444_v3  ;;  %v468_v32 = vpack.c.bf16 %v461_v30, %v460_v29 }
  0xed   : > { %1032 = vmatmul.mubr.bf16.gmra.mxu1 %v464_v62  ;;  %v1009_v6 = vpop.f32.mrf.mxu1  ;;  %v454_v8 = vmax.f32 %v413_v2, 0.0 }
  0xee   : > { %v415_v4 = vpop.f32.mrf.mxu0  ;;  %1035 = vmatprep.mubr.msk.bf16.mxu1 %vm1224_vm0, %v1223_v1  ;;  %v462_v33 = vmax.f32 %v445_v31, 0.0 }
  0xef   : > { %v416_v5 = vadd.f32 %v1429_v36, %v415_v4  ;;  %v447_v10 = vpop.f32.mrf.mxu1 }
  0xf0   : > { %v994_v7 = vpop.f32.mrf.mxu0  ;;  %v469_v34 = vpack.c.bf16 %v462_v33, %v462_v33 }
  0xf1   : > { %v455_v9 = vmax.f32 %v416_v5, 0.0  ;;  %v1010_v13 = vpop.f32.mrf.mxu1 }
  0xf2   : > { %v420_v11 = vpop.f32.mrf.mxu0 }
  0xf3   : > { %v465_v12 = vpack.c.bf16 %v455_v9, %v454_v8  ;;  %v421_v15 = vadd.f32 %v1429_v36, %v420_v11 }
  0xf4   : > { %v997_v14 = vpop.f32.mrf.mxu0 }
  0xf5   : > { %1036 = vmatmul.mubr.bf16.gmra.mxu1 %v465_v12  ;;  %v456_v19 = vmax.f32 %v421_v15, 0.0 }
  0xf6   : > { %v423_v16 = vpop.f32.mrf.mxu0  ;;  %1039 = vmatprep.mubr.msk.bf16.mxu1 %vm1224_vm0, %v1223_v1 }
  0xf7   : > { %v424_v17 = vadd.f32 %v1429_v36, %v423_v16  ;;  %v1466_v36 = vld [vmem:[%s1580_s4] ss:$0 sm:$0xff] }
  0xf8   : > { %v998_v18 = vpop.f32.mrf.mxu0 }
  0xf9   : > { %v457_v20 = vmax.f32 %v424_v17, 0.0 }
  0xfb   : > { %v466_v22 = vpack.c.bf16 %v457_v20, %v456_v19 }
  0xfd   : > { %1040 = vmatmul.mubr.bf16.gmra.mxu1 %v466_v22 }
  0xfe   : > { %1043 = vmatprep.mubr.msk.bf16.mxu1 %vm1224_vm0, %v1223_v1 }
 0x105   : > { %1044 = vmatmul.mubr.bf16.gmra.mxu1 %v467_v26 }
 0x106   : > { %1047 = vmatprep.mubr.msk.bf16.mxu1 %vm1224_vm0, %v1223_v1 }
 0x10d   : > { %1048 = vmatmul.mubr.bf16.gmra.mxu1 %v468_v32 }
 0x10e   : > { %1051 = vmatprep.mubr.msk.bf16.mxu1 %vm1224_vm0, %v1223_v1 }
 0x115   : > { %1052 = vmatmul.mubr.bf16.gmra.mxu1 %v469_v34 }
 0x1a5   : > { %v575_v38 = vpop.f32.mrf.mxu1 }
 0x1a6   : > { %v576_v40 = vadd.f32 %v1466_v36, %v575_v38 }
 0x1a7   : > { %v1029_v39 = vpop.f32.mrf.mxu1 }
 0x1a8   : > { %v629_v44 = vmax.f32 %v576_v40, 0.0 }
 0x1a9   : > { %v578_v41 = vpop.f32.mrf.mxu1 }
 0x1aa   : > { %v579_v42 = vadd.f32 %v1466_v36, %v578_v41 }
 0x1ab   : > { %v1030_v43 = vpop.f32.mrf.mxu1 }
 0x1ac   : > { %v630_v45 = vmax.f32 %v579_v42, 0.0 }
 0x1ad   : > { %v583_v46 = vpop.f32.mrf.mxu1 }
 0x1ae   : > { %v642_v47 = vpack.c.bf16 %v630_v45, %v629_v44  ;;  %v584_v49 = vadd.f32 %v1466_v36, %v583_v46 }
 0x1af   : > { %v1033_v48 = vpop.f32.mrf.mxu1 }
 0x1b0   : > { %1072 = vmatmul.mubr.bf16.vlgmr.msra.gmra.mxu0 %v642_v47  ;;  %v631_v53 = vmax.f32 %v584_v49, 0.0 }
 0x1b1   : > { %v586_v50 = vpop.f32.mrf.mxu1  ;;  %1075 = vmatprep.mubr.msk.bf16.mxu0 %vm1224_vm0, %v1223_v1 }
 0x1b2   : > { %v587_v51 = vadd.f32 %v1466_v36, %v586_v50 }
 0x1b3   : > { %v1034_v52 = vpop.f32.mrf.mxu1 }
 0x1b4   : > { %v632_v54 = vmax.f32 %v587_v51, 0.0 }
 0x1b5   : > { %v591_v55 = vpop.f32.mrf.mxu1 }
 0x1b6   : > { %v643_v56 = vpack.c.bf16 %v632_v54, %v631_v53  ;;  %v592_v58 = vadd.f32 %v1466_v36, %v591_v55 }
 0x1b7   : > { %v1037_v57 = vpop.f32.mrf.mxu1 }
 0x1b8   : > { %1076 = vmatmul.mubr.bf16.gmra.mxu0 %v643_v56  ;;  %v633_v62 = vmax.f32 %v592_v58, 0.0 }
 0x1b9   : > { %v594_v59 = vpop.f32.mrf.mxu1  ;;  %1079 = vmatprep.mubr.msk.bf16.mxu0 %vm1224_vm0, %v1223_v1 }
 0x1ba   : > { %v595_v60 = vadd.f32 %v1466_v36, %v594_v59 }
 0x1bb   : > { %v1038_v61 = vpop.f32.mrf.mxu1 }
 0x1bc   : > { %v634_v63 = vmax.f32 %v595_v60, 0.0 }
 0x1bd   : > { %v599_v0 = vpop.f32.mrf.mxu1 }
 0x1be   : > { %v644_v2 = vpack.c.bf16 %v634_v63, %v633_v62  ;;  %v600_v4 = vadd.f32 %v1466_v36, %v599_v0 }
 0x1bf   : > { %v1041_v3 = vpop.f32.mrf.mxu1 }
 0x1c0   : > { %1080 = vmatmul.mubr.bf16.gmra.mxu0 %v644_v2  ;;  %v635_v8 = vmax.f32 %v600_v4, 0.0 }
 0x1c1   : > { %v602_v5 = vpop.f32.mrf.mxu1  ;;  %1083 = vmatprep.mubr.msk.bf16.mxu0 %vm1224_vm0, %v1223_v1 }
 0x1c2   : > { %v603_v6 = vadd.f32 %v1466_v36, %v602_v5 }
 0x1c3   : > { %v1042_v7 = vpop.f32.mrf.mxu1 }
 0x1c4   : > { %v636_v9 = vmax.f32 %v603_v6, 0.0 }
 0x1c5   : > { %v607_v10 = vpop.f32.mrf.mxu1 }
 0x1c6   : > { %v645_v11 = vpack.c.bf16 %v636_v9, %v635_v8  ;;  %v608_v13 = vadd.f32 %v1466_v36, %v607_v10 }
 0x1c7   : > { %v1045_v12 = vpop.f32.mrf.mxu1 }
 0x1c8   : > { %1084 = vmatmul.mubr.bf16.gmra.mxu0 %v645_v11  ;;  %v637_v17 = vmax.f32 %v608_v13, 0.0 }
 0x1c9   : > { %v610_v14 = vpop.f32.mrf.mxu1  ;;  %1087 = vmatprep.mubr.msk.bf16.mxu0 %vm1224_vm0, %v1223_v1 }
 0x1ca   : > { %v611_v15 = vadd.f32 %v1466_v36, %v610_v14 }
 0x1cb   : > { %v1046_v16 = vpop.f32.mrf.mxu1 }
 0x1cc   : > { %v638_v18 = vmax.f32 %v611_v15, 0.0 }
 0x1cd   : > { %v615_v19 = vpop.f32.mrf.mxu1 }
 0x1ce   : > { %v646_v20 = vpack.c.bf16 %v638_v18, %v637_v17  ;;  %v616_v22 = vadd.f32 %v1466_v36, %v615_v19 }
 0x1cf   : > { %v1049_v21 = vpop.f32.mrf.mxu1 }
 0x1d0   : > { %1088 = vmatmul.mubr.bf16.gmra.mxu0 %v646_v20  ;;  %v639_v26 = vmax.f32 %v616_v22, 0.0 }
 0x1d1   : > { %v618_v23 = vpop.f32.mrf.mxu1  ;;  %1091 = vmatprep.mubr.msk.bf16.mxu0 %vm1224_vm0, %v1223_v1 }
 0x1d2   : > { %v619_v24 = vadd.f32 %v1466_v36, %v618_v23 }
 0x1d3   : > { %v1050_v25 = vpop.f32.mrf.mxu1 }
 0x1d4   : > { %v640_v27 = vmax.f32 %v619_v24, 0.0 }
 0x1d5   : > { %v623_v28 = vpop.f32.mrf.mxu1 }
 0x1d6   : > { %v647_v29 = vpack.c.bf16 %v640_v27, %v639_v26  ;;  %v624_v30 = vadd.f32 %v1466_v36, %v623_v28 }
 0x1d7   : > { %v1053_v31 = vpop.f32.mrf.mxu1 }
 0x1d8   : > { %v641_v32 = vmax.f32 %v624_v30, 0.0  ;;  %1092 = vmatmul.mubr.bf16.gmra.mxu0 %v647_v29 }
 0x1d9   : > { %v626_v33 = vpop.f32.mrf.mxu1  ;;  %1095 = vmatprep.mubr.msk.bf16.mxu0 %vm1224_vm0, %v1223_v1 }
 0x1da   : > { %v648_v35 = vpack.c.bf16 %v641_v32, %v641_v32 }
 0x1db   : > { %v1054_v34 = vpop.f32.mrf.mxu1 }
 0x1e0   : > { %1096 = vmatmul.mubr.bf16.gmra.mxu0 %v648_v35 }
 0x270   : > { %v754_v38 = vpop.f32.mrf.mxu0 }
 0x271   : > { %v755_v39 = vadd.f32 %v926_v37, %v754_v38 }
 0x272   : > { %v1073_v36 = vpop.f32.mrf.mxu0 }
 0x273   : > { %808 = vst [vmem:[%s1499_s22] sm:$0xff] %v755_v39 }
 0x274   : > { %v757_v1 = vpop.f32.mrf.mxu0 }
 0x275   : > { %v758_v40 = vadd.f32 %v926_v37, %v757_v1 }
 0x276   : > { %v1074_v41 = vpop.f32.mrf.mxu0 }
 0x277   : > { %809 = vst [vmem:[%s1499_s22 + $0x8] sm:$0xff] %v758_v40 }
 0x278   : > { %v762_v42 = vpop.f32.mrf.mxu0 }
 0x279   : > { %v763_v43 = vadd.f32 %v926_v37, %v762_v42 }
 0x27a   : > { %v1077_v44 = vpop.f32.mrf.mxu0 }
 0x27b   : > { %810 = vst [vmem:[%s1499_s22 + $0x10] sm:$0xff] %v763_v43 }
 0x27c   : > { %v765_v45 = vpop.f32.mrf.mxu0 }
 0x27d   : > { %v766_v46 = vadd.f32 %v926_v37, %v765_v45 }
 0x27e   : > { %v1078_v47 = vpop.f32.mrf.mxu0 }
 0x27f   : > { %811 = vst [vmem:[%s1499_s22 + $0x18] sm:$0xff] %v766_v46 }
 0x280   : > { %v770_v48 = vpop.f32.mrf.mxu0 }
 0x281   : > { %v771_v49 = vadd.f32 %v926_v37, %v770_v48 }
 0x282   : > { %v1081_v50 = vpop.f32.mrf.mxu0 }
 0x283   : > { %812 = vst [vmem:[%s1499_s22 + $0x20] sm:$0xff] %v771_v49 }
 0x284   : > { %v773_v51 = vpop.f32.mrf.mxu0 }
 0x285   : > { %v774_v52 = vadd.f32 %v926_v37, %v773_v51 }
 0x286   : > { %v1082_v53 = vpop.f32.mrf.mxu0 }
 0x287   : > { %813 = vst [vmem:[%s1499_s22 + $0x28] sm:$0xff] %v774_v52 }
 0x288   : > { %v778_v54 = vpop.f32.mrf.mxu0 }
 0x289   : > { %v779_v55 = vadd.f32 %v926_v37, %v778_v54 }
 0x28a   : > { %v1085_v56 = vpop.f32.mrf.mxu0 }
 0x28b   : > { %814 = vst [vmem:[%s1499_s22 + $0x30] sm:$0xff] %v779_v55 }
 0x28c   : > { %v781_v57 = vpop.f32.mrf.mxu0 }
 0x28d   : > { %v782_v58 = vadd.f32 %v926_v37, %v781_v57 }
 0x28e   : > { %v1086_v59 = vpop.f32.mrf.mxu0 }
 0x28f   : > { %815 = vst [vmem:[%s1499_s22 + $0x38] sm:$0xff] %v782_v58 }
 0x290   : > { %v786_v60 = vpop.f32.mrf.mxu0 }
 0x291   : > { %v787_v61 = vadd.f32 %v926_v37, %v786_v60 }
 0x292   : > { %v1089_v62 = vpop.f32.mrf.mxu0 }
 0x293   : > { %816 = vst [vmem:[%s1499_s22 + $0x40] sm:$0xff] %v787_v61 }
 0x294   : > { %v789_v63 = vpop.f32.mrf.mxu0 }
 0x295   : > { %v790_v0 = vadd.f32 %v926_v37, %v789_v63 }
 0x296   : > { %v1090_v2 = vpop.f32.mrf.mxu0 }
 0x297   : > { %817 = vst [vmem:[%s1499_s22 + $0x48] sm:$0xff] %v790_v0 }
 0x298   : > { %v794_v3 = vpop.f32.mrf.mxu0 }
 0x299   : > { %v795_v4 = vadd.f32 %v926_v37, %v794_v3 }
 0x29a   : > { %v1093_v5 = vpop.f32.mrf.mxu0 }
 0x29b   : > { %818 = vst [vmem:[%s1499_s22 + $0x50] sm:$0xff] %v795_v4 }
 0x29c   : > { %v797_v6 = vpop.f32.mrf.mxu0 }
 0x29d   : > { %v798_v7 = vadd.f32 %v926_v37, %v797_v6 }
 0x29e   : > { %v1094_v8 = vpop.f32.mrf.mxu0 }
 0x29f   : > { %819 = vst [vmem:[%s1499_s22 + $0x58] sm:$0xff] %v798_v7 }
 0x2a0   : > { %v802_v9 = vpop.f32.mrf.mxu0 }
 0x2a1   : > { %v803_v10 = vadd.f32 %v926_v37, %v802_v9 }
 0x2a2   : > { %v1097_v11 = vpop.f32.mrf.mxu0  ;;  %828 = sbr.rel (!%p1306_p5) target bundleno = 706 (0x2c2), region = 52 }
 0x2a3   : > { %820 = vst [vmem:[%s1499_s22 + $0x60] sm:$0xff] %v803_v10 }
 0x2a4   : > { %v805_v12 = vpop.f32.mrf.mxu0 }
 0x2a6   : > { %v1098_v13 = vpop.f32.mrf.mxu0 }
 0x2a7   : > { %s1591_s29 = smov (!%p831_p11, %s830_s29), 13 }
 0x2a8   : > { %s1521_s8 = sshll.u32 %s1591_s29, 7 }
 0x2a9   : > { %s835_s9 = ssub.s32 1664, %s1521_s8 }
 0x2aa   : > { %836 = vsyncadd %s1516_s23, %s835_s9  ;;  %p936_p12 = scmp.ne.s32.totalorder %s1521_s8, 0  ;;  %s942_s13 = smul.u32 1664, %s1289_s28 }
 0x2ab   : > { %s841_s14 = sshll.u32 %s1499_s22, 4  ;;  %s1225_s18 = smov [#allocation2]   ;;  %s1533_s14 = int_to_ptr.vmem [resolvable:$true] %s841_s14 }
 0x2ac   : > { %s1531_s17 = scalar_lea.hbm %s1583_s7, %s942_s13  ;;  %s1161_s15 = scalar_lea.vmem %s1533_s14, %s1521_s8 }
 0x2ad   : > { %p1162_p13 = scmp.ne.s32.totalorder %s1533_s14, %s1161_s15  ;;  %s1165_s19 = sshll.u32 %s1225_s18, 4  ;;  %s1166_s19 = int_to_ptr.vmem [resolvable:$false] %s1165_s19 }
 0x2ae   : > { %s1167_s28 = scalar_lea.vmem %s1166_s19, 3328  ;;  %p1168_p2 = scmp.lt.s32.totalorder %s1533_s14, %s1166_s19 }
 0x2af   : > { %p1163_p0 = pnand %p1162_p13, %p936_p12  ;;  %p1169_p3 = scmp.lt.s32.totalorder %s1167_s28, %s1161_s15 }
 0x2b1   : > { %p1164_p1 = pneg %p1163_p0  ;;  %p1170_p4 = por %p1169_p3, %p1168_p2 }
 0x2b3   : > { %p1171_p5 = pnand %p1170_p4, %p1164_p1 }
 0x2b5   : > { %1174 = shalt.err (!%p1171_p5)
}
 0x2b6   : > { %s1175_s20 = scalar_lea.hbm %s1531_s17, %s1521_s8  ;;  %s1179_s29 = scalar_lea.hbm %s1583_s7, 3200 }
 0x2b7   : > { %p1176_p7 = scmp.ne.s32.totalorder %s1531_s17, %s1175_s20  ;;  %p1180_p10 = scmp.lt.s32.totalorder %s1531_s17, %s1583_s7 }
 0x2b8   : > { %p1181_p11 = scmp.lt.s32.totalorder %s1179_s29, %s1175_s20 }
 0x2b9   : > { %p1177_p8 = pnand %p1176_p7, %p936_p12 }
 0x2ba   : > { %p1182_p13 = por %p1181_p11, %p1180_p10 }
 0x2bb   : > { %p1178_p9 = pneg %p1177_p8 }
 0x2bd   : > { %p1183_p0 = pnand %p1182_p13, %p1178_p9 }
 0x2bf   : > { %1186 = shalt.err (!%p1183_p0)
}
 0x2c0   : > { %s1226_s11 = smov 128   ;;  %s1227_s16 = smov 8  }
 0x2c1   : > { %847 = dma.vmem_to_hbm [thread:$0]  (%p936_p12), %s1533_s14, %s1521_s8, %s1531_s17, %s1516_s23, %s1226_s11, %s1226_s11, %s1227_s16  }
 0x2c2 PF: > { %p1107_p1 = scmp.ge.s32.totalorder %s1221_s27, 2  ;;  %s856_s15 = sand.u32 1, %s1209_s24  }
 0x2c3   : > { %s857_s18 = scalar_lea.sflag [#allocation3], %s856_s15 }
 0x2c4   : > { %p1104_p2 = pnand %p1107_p1, %p1310_p6 }
 0x2c6   : > { %p1105_p3 = pneg %p1104_p2 }
 0x2c8   : > { %1204 = dma.done.wait (%p1105_p3), %s857_s18, 1664  }
 0x2c9   : > { %1206 = vsyncadd (%p1105_p3), %s857_s18, 4294965632  ;;  %p17_p4 = scmp.ge.s32.totalorder %s1293_s30, 4   ;;  %s1586_s24 = smov %s1213_s25 }
 0x2ca   : > { %s1587_s25 = smov %s1217_s26  ;;  %s1588_s26 = smov %s1304_s10 }
 0x2cb   : > { %s1589_s27 = smov %s1293_s30  ;;  %19 = sbr.rel (!%p17_p4) target bundleno = 3 (0x3), region = 83 }
 0x2d0   :  { %862 = vsyncpa [#allocation3], 1 }
 0x2d1   :  { %864 = vsyncpa [#allocation3 + $0x1], 1 }

</bundles_post_ra>
